<compile_context>
chip_gen: v7x
topology: tpu7x:2x2x1
jax: 0.10.0
libtpu: 0.0.40
codegen_flags: <defaults>
</compile_context>

<pallas_src>
import functools

import jax
import jax.numpy as jnp
import numpy as np
from jax import lax
from jax.experimental import pallas as pl
from jax.experimental.pallas import tpu as pltpu

# ----------------- small synthetic CLIP-ViT config -----------------
BATCH = 2
IN_CH = 3
IMAGE_SIZE = 16
PATCH_SIZE = 8
HIDDEN = 32
HEADS = 4
INTERMEDIATE = 64
NUM_LAYERS = 3
SELECT_LAYER = -2            # args.mm_vision_select_layer
SELECT_FEATURE = "patch"     # default in CLIPVisionTower
LN_EPS = 1e-5

GRID_1D = IMAGE_SIZE // PATCH_SIZE
NUM_PATCHES = GRID_1D * GRID_1D
SEQ = NUM_PATCHES + 1
PATCH_DIM = IN_CH * PATCH_SIZE * PATCH_SIZE
HEAD_DIM = HIDDEN // HEADS

# hidden_states has NUM_LAYERS+1 entries (index 0 = pre_layrnorm output); selecting
# hidden_states[SELECT_LAYER] means only this many encoder layers are ever needed.
LAYERS_TO_RUN = NUM_LAYERS + 1 + SELECT_LAYER if SELECT_LAYER < 0 else SELECT_LAYER
OUT_TOKENS = NUM_PATCHES if SELECT_FEATURE == "patch" else SEQ

# Set to jnp.bfloat16 on v6e/v7x for real CLIP-L shapes (halves weight DMA + vreg pressure,
# f32 accumulation preserved via preferred_element_type). Kept f32 here so the small-shape
# check against the f32 reference stays tight.
MXU_DTYPE = jnp.float32


# ----------------- helpers -----------------
def _layernorm(x, g, b):
    mu = jnp.mean(x, axis=-1, keepdims=True)
    var = jnp.mean((x - mu) ** 2, axis=-1, keepdims=True)
    return (x - mu) * lax.rsqrt(var + LN_EPS) * g + b


def _quick_gelu(x):
    return x * jax.nn.sigmoid(1.702 * x)


def _mm(a, b):
    return jnp.dot(a.astype(MXU_DTYPE), b.astype(MXU_DTYPE),
                   preferred_element_type=jnp.float32)


def _bcast_spec(arr):
    """Full-array BlockSpec, identical block for every grid step (weights are DMA'd once)."""
    zeros = (0,) * arr.ndim
    return pl.BlockSpec(arr.shape, lambda b, _z=zeros: _z)


# ----------------- fused tower kernel (one program per image) -----------------
def tower_kernel(patches_ref,            # (1, N, C*P*P)
                 w_patch_ref,            # (C*P*P, D)
                 cls_ref,                # (1, D)
                 pos_ref,                # (S, D)
                 pre_ln_ref,             # (2, D)   [gamma; beta]
                 wqkv_ref,               # (L, D, 3D)   q-part pre-scaled by head_dim^-0.5
                 wo_ref,                 # (L, D, D)
                 w1_ref,                 # (L, D, I)
                 w2_ref,                 # (L, I, D)
                 dvec_ref,               # (L, 6, D)  [ln1_g, ln1_b, ln2_g, ln2_b, bo, b2]
                 bqkv_ref,               # (L, 1, 3D) q-part pre-scaled
                 b1_ref,                 # (L, 1, I)
                 out_ref,                # (1, OUT_TOKENS, D)
                 x_scr,                  # VMEM (S, D) scratch
                 *, num_heads, num_layers_run, out_tokens):
    d = out_ref.shape[-1]
    hd = d // num_heads
    seq = x_scr.shape[0]

    # ---- embeddings: patch matmul, CLS row + patch rows written directly (no concat) ----
    emb = _mm(patches_ref[0], w_patch_ref[...])          # (N, D)
    x_scr[0:1, :] = cls_ref[...]
    x_scr[1:, :] = emb
    x = _layernorm(x_scr[...] + pos_ref[...],
                   pre_ln_ref[0:1, :], pre_ln_ref[1:2, :])   # pre_layrnorm == hidden_states[0]

    # ---- encoder layers, activation stays in vregs/VMEM across the whole loop ----
    def layer_body(l, x):
        vecs = dvec_ref[l]                               # (6, D)
        ln1_g, ln1_b = vecs[0:1], vecs[1:2]
        ln2_g, ln2_b = vecs[2:3], vecs[3:4]
        bo, b2 = vecs[4:5], vecs[5:6]
        wqkv = wqkv_ref[l]                               # (D, 3D)
        bqkv = bqkv_ref[l]                               # (1, 3D)
        wo = wo_ref[l]                                   # (D, D)
        w1, b1 = w1_ref[l], b1_ref[l]                    # (D, I), (1, I)
        w2 = w2_ref[l]                                   # (I, D)

        # --- self-attention (pre-LN); fused QKV projection, scale folded into Wq/bq ---
        h = _layernorm(x, ln1_g, ln1_b)
        qkv = _mm(h, wqkv) + bqkv                        # (S, 3D)

        # Per-head attention; head contexts folded straight through Wo (no lane concat).
        ctx = jnp.zeros_like(x)
        for hh in range(num_heads):
            qs = qkv[:, hh * hd:(hh + 1) * hd]
            ks = qkv[:, d + hh * hd:d + (hh + 1) * hd]
            vs = qkv[:, 2 * d + hh * hd:2 * d + (hh + 1) * hd]
            s = _mm(qs, ks.T)                            # (S, S)
            s = s - jnp.max(s, axis=-1, keepdims=True)
            p = jnp.exp(s)
            p = p / jnp.sum(p, axis=-1, keepdims=True)
            o_h = _mm(p, vs)                             # (S, hd)
            ctx = ctx + _mm(o_h, wo[hh * hd:(hh + 1) * hd, :])
        x = x + ctx + bo

        # --- MLP (pre-LN, quick_gelu) ---
        h2 = _layernorm(x, ln2_g, ln2_b)
        f = _quick_gelu(_mm(h2, w1) + b1)
        x = x + _mm(f, w2) + b2
        return x

    x = lax.fori_loop(0, num_layers_run, layer_body, x, unroll=True)

    # ---- feature select in-kernel: 'patch' drops the CLS row ----
    out_ref[0] = x[seq - out_tokens:, :]


# ----------------- host-side weight packing (one-time transform) -----------------
def pack_tower_params(params):
    layers = params["layers"][:LAYERS_TO_RUN]
    scale = HEAD_DIM ** -0.5
    wqkv = jnp.stack([jnp.concatenate(
        [lp["wq"] * scale, lp["wk"], lp["wv"]], axis=1) for lp in layers])        # (L, D, 3D)
    bqkv = jnp.stack([jnp.concatenate(
        [lp["bq"] * scale, lp["bk"], lp["bv"]], axis=1) for lp in layers])        # (L, 1, 3D)
    wo = jnp.stack([lp["wo"] for lp in layers])                                    # (L, D, D)
    w1 = jnp.stack([lp["w1"] for lp in layers])                                    # (L, D, I)
    w2 = jnp.stack([lp["w2"] for lp in layers])                                    # (L, I, D)
    b1 = jnp.stack([lp["b1"] for lp in layers])                                    # (L, 1, I)
    dvec = jnp.stack([jnp.concatenate(
        [lp["ln1_g"], lp["ln1_b"], lp["ln2_g"], lp["ln2_b"], lp["bo"], lp["b2"]],
        axis=0) for lp in layers])                                                 # (L, 6, D)
    pre_ln = jnp.concatenate([params["pre_ln_g"], params["pre_ln_b"]], axis=0)     # (2, D)
    return dict(wqkv=wqkv, bqkv=bqkv, wo=wo, w1=w1, w2=w2, b1=b1, dvec=dvec, pre_ln=pre_ln)


# ----------------- glue: patch extraction + tower forward -----------------
def extract_patches(images):
    # images: (B, C, H, W) NCHW; flatten each patch as (c, ph, pw) so the conv == one matmul.
    B, C, H, W = images.shape
    x = images.reshape(B, C, GRID_1D, PATCH_SIZE, GRID_1D, PATCH_SIZE)
    x = x.transpose(0, 2, 4, 1, 3, 5)                    # (B, gh, gw, C, ph, pw)
    return x.reshape(B, NUM_PATCHES, PATCH_DIM)


def clip_vision_tower_forward(images, params):
    B = images.shape[0]
    patches = extract_patches(images.astype(jnp.float32))
    packed = pack_tower_params(params)
    weights = (params["w_patch"], params["cls"], params["pos"], packed["pre_ln"],
               packed["wqkv"], packed["wo"], packed["w1"], packed["w2"],
               packed["dvec"], packed["bqkv"], packed["b1"])

    kernel = functools.partial(tower_kernel, num_heads=HEADS,
                               num_layers_run=LAYERS_TO_RUN, out_tokens=OUT_TOKENS)
    feats = pl.pallas_call(
        kernel,
        grid=(B,),
        in_specs=[pl.BlockSpec((1, NUM_PATCHES, PATCH_DIM), lambda b: (b, 0, 0))]
                 + [_bcast_spec(w) for w in weights],
        out_specs=pl.BlockSpec((1, OUT_TOKENS, HIDDEN), lambda b: (b, 0, 0)),
        out_shape=jax.ShapeDtypeStruct((B, OUT_TOKENS, HIDDEN), jnp.float32),
        scratch_shapes=[pltpu.VMEM((SEQ, HIDDEN), jnp.float32)],
        compiler_params=pltpu.CompilerParams(dimension_semantics=("parallel",)),
    )(patches, *weights)
    return feats.astype(images.dtype)


# ----------------- deterministic synthetic parameters -----------------
def init_params(key):
    ks = iter(jax.random.split(key, 64))
    std = 0.02
    conv_w = jax.random.normal(next(ks), (HIDDEN, IN_CH, PATCH_SIZE, PATCH_SIZE), jnp.float32) * std
    params = {
        "w_patch": conv_w.reshape(HIDDEN, PATCH_DIM).T,              # (C*P*P, D), conv has no bias
        "cls": jax.random.normal(next(ks), (1, HIDDEN), jnp.float32) * std,
        "pos": jax.random.normal(next(ks), (SEQ, HIDDEN), jnp.float32) * std,
        "pre_ln_g": jnp.ones((1, HIDDEN), jnp.float32),
        "pre_ln_b": jnp.zeros((1, HIDDEN), jnp.float32),
        "layers": [],
    }
    for _ in range(NUM_LAYERS):
        lp = {
            "ln1_g": jnp.ones((1, HIDDEN), jnp.float32),
            "ln1_b": jnp.zeros((1, HIDDEN), jnp.float32),
            "wq": jax.random.normal(next(ks), (HIDDEN, HIDDEN), jnp.float32) * std,
            "bq": jnp.zeros((1, HIDDEN), jnp.float32),
            "wk": jax.random.normal(next(ks), (HIDDEN, HIDDEN), jnp.float32) * std,
            "bk": jnp.zeros((1, HIDDEN), jnp.float32),
            "wv": jax.random.normal(next(ks), (HIDDEN, HIDDEN), jnp.float32) * std,
            "bv": jnp.zeros((1, HIDDEN), jnp.float32),
            "wo": jax.random.normal(next(ks), (HIDDEN, HIDDEN), jnp.float32) * std,
            "bo": jnp.zeros((1, HIDDEN), jnp.float32),
            "ln2_g": jnp.ones((1, HIDDEN), jnp.float32),
            "ln2_b": jnp.zeros((1, HIDDEN), jnp.float32),
            "w1": jax.random.normal(next(ks), (HIDDEN, INTERMEDIATE), jnp.float32) * std,
            "b1": jnp.zeros((1, INTERMEDIATE), jnp.float32),
            "w2": jax.random.normal(next(ks), (INTERMEDIATE, HIDDEN), jnp.float32) * std,
            "b2": jnp.zeros((1, HIDDEN), jnp.float32),
        }
        params["layers"].append(lp)
    return params


# ----------------- pure-JAX reference (full tower, for the sanity check) -----------------
def reference_forward(images, params):
    patches = extract_patches(images.astype(jnp.float32))
    emb = patches @ params["w_patch"]
    cls = jnp.broadcast_to(params["cls"][None], (images.shape[0], 1, HIDDEN))
    x = jnp.concatenate([cls, emb], axis=1) + params["pos"][None]
    x = _layernorm(x, params["pre_ln_g"], params["pre_ln_b"])
    hs = [x]
    for lp in params["layers"]:
        h = _layernorm(x, lp["ln1_g"], lp["ln1_b"])
        q = (h @ lp["wq"] + lp["bq"]) * (HEAD_DIM ** -0.5)
        k = h @ lp["wk"] + lp["bk"]
        v = h @ lp["wv"] + lp["bv"]
        B, S, _ = q.shape
        q = q.reshape(B, S, HEADS, HEAD_DIM).transpose(0, 2, 1, 3)
        k = k.reshape(B, S, HEADS, HEAD_DIM).transpose(0, 2, 1, 3)
        v = v.reshape(B, S, HEADS, HEAD_DIM).transpose(0, 2, 1, 3)
        s = jnp.einsum("bhqd,bhkd->bhqk", q, k)
        p = jax.nn.softmax(s, axis=-1)
        a = jnp.einsum("bhqk,bhkd->bhqd", p, v).transpose(0, 2, 1, 3).reshape(B, S, HIDDEN)
        x = x + (a @ lp["wo"] + lp["bo"])
        h2 = _layernorm(x, lp["ln2_g"], lp["ln2_b"])
        f = _quick_gelu(h2 @ lp["w1"] + lp["b1"]) @ lp["w2"] + lp["b2"]
        x = x + f
        hs.append(x)
    feats = hs[SELECT_LAYER]
    if SELECT_FEATURE == "patch":
        feats = feats[:, 1:]
    return feats.astype(images.dtype)


if __name__ == "__main__":
    key = jax.random.PRNGKey(0)
    k_img, k_par = jax.random.split(key)
    images = jax.random.normal(k_img, (BATCH, IN_CH, IMAGE_SIZE, IMAGE_SIZE), jnp.float32)
    params = init_params(k_par)

    feats = clip_vision_tower_forward(images, params)
    feats = jax.block_until_ready(feats)
    assert feats.shape == (BATCH, OUT_TOKENS, HIDDEN), feats.shape

    ref = jax.block_until_ready(reference_forward(images, params))
    np.testing.assert_allclose(np.asarray(feats), np.asarray(ref), rtol=1e-4, atol=1e-4)

    print("KERNEL_OK")
</pallas_src>

<mosaic_0001>
module attributes {stable_mosaic.version = 11 : i64} {
  func.func @tower_kernel(%arg0: i32, %arg1: memref<1x4x192xf32, #tpu.memory_space<vmem>>, %arg2: memref<192x32xf32, #tpu.memory_space<vmem>>, %arg3: memref<1x32xf32, #tpu.memory_space<vmem>>, %arg4: memref<5x32xf32, #tpu.memory_space<vmem>>, %arg5: memref<2x32xf32, #tpu.memory_space<vmem>>, %arg6: memref<2x32x96xf32, #tpu.memory_space<vmem>>, %arg7: memref<2x32x32xf32, #tpu.memory_space<vmem>>, %arg8: memref<2x32x64xf32, #tpu.memory_space<vmem>>, %arg9: memref<2x64x32xf32, #tpu.memory_space<vmem>>, %arg10: memref<2x6x32xf32, #tpu.memory_space<vmem>>, %arg11: memref<2x1x96xf32, #tpu.memory_space<vmem>>, %arg12: memref<2x1x64xf32, #tpu.memory_space<vmem>>, %arg13: memref<1x4x32xf32, #tpu.memory_space<vmem>>, %arg14: memref<5x32xf32, #tpu.memory_space<vmem>>) attributes {dimension_semantics = [#tpu.dimension_semantics<parallel>], iteration_bounds = array<i64: 2>, scalar_prefetch = 0 : i64, scratch_operands = 1 : i64, tpu.core_type = #tpu.core_type<tc>, window_params = [{transform_indices = @transform_0, window_bounds = array<i64: 1, 4, 192>}, {pipeline_mode = #tpu.pipeline_mode<synchronous>, transform_indices = @transform_1, window_bounds = array<i64: 192, 32>}, {pipeline_mode = #tpu.pipeline_mode<synchronous>, transform_indices = @transform_2, window_bounds = array<i64: 1, 32>}, {pipeline_mode = #tpu.pipeline_mode<synchronous>, transform_indices = @transform_3, window_bounds = array<i64: 5, 32>}, {pipeline_mode = #tpu.pipeline_mode<synchronous>, transform_indices = @transform_4, window_bounds = array<i64: 2, 32>}, {pipeline_mode = #tpu.pipeline_mode<synchronous>, transform_indices = @transform_5, window_bounds = array<i64: 2, 32, 96>}, {pipeline_mode = #tpu.pipeline_mode<synchronous>, transform_indices = @transform_6, window_bounds = array<i64: 2, 32, 32>}, {pipeline_mode = #tpu.pipeline_mode<synchronous>, transform_indices = @transform_7, window_bounds = array<i64: 2, 32, 64>}, {pipeline_mode = #tpu.pipeline_mode<synchronous>, transform_indices = @transform_8, window_bounds = array<i64: 2, 64, 32>}, {pipeline_mode = #tpu.pipeline_mode<synchronous>, transform_indices = @transform_9, window_bounds = array<i64: 2, 6, 32>}, {pipeline_mode = #tpu.pipeline_mode<synchronous>, transform_indices = @transform_10, window_bounds = array<i64: 2, 1, 96>}, {pipeline_mode = #tpu.pipeline_mode<synchronous>, transform_indices = @transform_11, window_bounds = array<i64: 2, 1, 64>}, {transform_indices = @transform_12, window_bounds = array<i64: 1, 4, 32>}]} {
    %c0 = arith.constant 0 : index
    %c0_0 = arith.constant 0 : index
    %c0_1 = arith.constant 0 : index
    %0 = vector.load %arg1[%c0, %c0_0, %c0_1] : memref<1x4x192xf32, #tpu.memory_space<vmem>>, vector<1x4x192xf32>
    %1 = vector.shape_cast %0 : vector<1x4x192xf32> to vector<4x192xf32>
    %c0_2 = arith.constant 0 : index
    %c0_3 = arith.constant 0 : index
    %2 = vector.load %arg2[%c0_2, %c0_3] : memref<192x32xf32, #tpu.memory_space<vmem>>, vector<192x32xf32>
    %cst = arith.constant dense<0.000000e+00> : vector<4x32xf32>
    %3 = tpu.matmul %1, %2, %cst {dimension_numbers = #tpu.dot_dimension_numbers<[1], [0], [0], [1], [0, 0, 1, 1], [], []>} : vector<4x192xf32>, vector<192x32xf32>, vector<4x32xf32> -> vector<4x32xf32>
    %c0_4 = arith.constant 0 : index
    %c0_5 = arith.constant 0 : index
    %4 = vector.load %arg3[%c0_4, %c0_5] : memref<1x32xf32, #tpu.memory_space<vmem>>, vector<1x32xf32>
    %c0_6 = arith.constant 0 : index
    %c0_7 = arith.constant 0 : index
    %5 = vector.load %arg14[%c0_6, %c0_7] : memref<5x32xf32, #tpu.memory_space<vmem>>, vector<1x32xf32>
    tpu.vector_store %arg14[%c0_6, %c0_7], %4 {strides = array<i32>} : memref<5x32xf32, #tpu.memory_space<vmem>>, vector<1x32xf32>,
    %c1 = arith.constant 1 : index
    %c0_8 = arith.constant 0 : index
    %6 = vector.load %arg14[%c1, %c0_8] : memref<5x32xf32, #tpu.memory_space<vmem>>, vector<4x32xf32>
    tpu.vector_store %arg14[%c1, %c0_8], %3 {strides = array<i32>} : memref<5x32xf32, #tpu.memory_space<vmem>>, vector<4x32xf32>,
    %c0_9 = arith.constant 0 : index
    %c0_10 = arith.constant 0 : index
    %7 = vector.load %arg14[%c0_9, %c0_10] : memref<5x32xf32, #tpu.memory_space<vmem>>, vector<5x32xf32>
    %c0_11 = arith.constant 0 : index
    %c0_12 = arith.constant 0 : index
    %8 = vector.load %arg4[%c0_11, %c0_12] : memref<5x32xf32, #tpu.memory_space<vmem>>, vector<5x32xf32>
    %9 = arith.addf %7, %8 : vector<5x32xf32>
    %c0_13 = arith.constant 0 : index
    %c0_14 = arith.constant 0 : index
    %10 = vector.load %arg5[%c0_13, %c0_14] : memref<2x32xf32, #tpu.memory_space<vmem>>, vector<1x32xf32>
    %c1_15 = arith.constant 1 : index
    %c0_16 = arith.constant 0 : index
    %11 = vector.load %arg5[%c1_15, %c0_16] : memref<2x32xf32, #tpu.memory_space<vmem>>, vector<1x32xf32>
    %cst_17 = arith.constant dense<0.000000e+00> : vector<5xf32>
    %12 = vector.multi_reduction <add>, %9, %cst_17 [1] : vector<5x32xf32> to vector<5xf32>
    %13 = vector.shape_cast %12 : vector<5xf32> to vector<5x1xf32>
    %cst_18 = arith.constant 3.200000e+01 : f32
    %14 = vector.broadcast %cst_18 : f32 to vector<5x1xf32>
    %15 = arith.divf %13, %14 : vector<5x1xf32>
    %16 = vector.broadcast %15 : vector<5x1xf32> to vector<5x32xf32>
    %17 = arith.subf %9, %16 : vector<5x32xf32>
    %18 = arith.mulf %17, %17 : vector<5x32xf32>
    %cst_19 = arith.constant dense<0.000000e+00> : vector<5xf32>
    %19 = vector.multi_reduction <add>, %18, %cst_19 [1] : vector<5x32xf32> to vector<5xf32>
    %20 = vector.shape_cast %19 : vector<5xf32> to vector<5x1xf32>
    %cst_20 = arith.constant 3.200000e+01 : f32
    %21 = vector.broadcast %cst_20 : f32 to vector<5x1xf32>
    %22 = arith.divf %20, %21 : vector<5x1xf32>
    %23 = vector.broadcast %15 : vector<5x1xf32> to vector<5x32xf32>
    %24 = arith.subf %9, %23 : vector<5x32xf32>
    %cst_21 = arith.constant 9.99999974E-6 : f32
    %25 = vector.broadcast %cst_21 : f32 to vector<5x1xf32>
    %26 = arith.addf %22, %25 : vector<5x1xf32>
    %27 = math.rsqrt %26 : vector<5x1xf32>
    %28 = vector.broadcast %27 : vector<5x1xf32> to vector<5x32xf32>
    %29 = arith.mulf %24, %28 : vector<5x32xf32>
    %30 = vector.broadcast %10 : vector<1x32xf32> to vector<5x32xf32>
    %31 = arith.mulf %29, %30 : vector<5x32xf32>
    %32 = vector.broadcast %11 : vector<1x32xf32> to vector<5x32xf32>
    %33 = arith.addf %31, %32 : vector<5x32xf32>
    %c0_i32 = arith.constant 0 : i32
    %34 = arith.index_cast %c0_i32 : i32 to index
    %c0_22 = arith.constant 0 : index
    %c0_23 = arith.constant 0 : index
    %35 = vector.load %arg10[%34, %c0_22, %c0_23] : memref<2x6x32xf32, #tpu.memory_space<vmem>>, vector<1x6x32xf32>
    %36 = vector.shape_cast %35 : vector<1x6x32xf32> to vector<6x32xf32>
    %37 = vector.extract_strided_slice %36 {offsets = [0, 0], sizes = [1, 32], strides = [1, 1]} : vector<6x32xf32> to vector<1x32xf32>
    %38 = vector.extract_strided_slice %36 {offsets = [1, 0], sizes = [1, 32], strides = [1, 1]} : vector<6x32xf32> to vector<1x32xf32>
    %39 = vector.extract_strided_slice %36 {offsets = [2, 0], sizes = [1, 32], strides = [1, 1]} : vector<6x32xf32> to vector<1x32xf32>
    %40 = vector.extract_strided_slice %36 {offsets = [3, 0], sizes = [1, 32], strides = [1, 1]} : vector<6x32xf32> to vector<1x32xf32>
    %41 = vector.extract_strided_slice %36 {offsets = [4, 0], sizes = [1, 32], strides = [1, 1]} : vector<6x32xf32> to vector<1x32xf32>
    %42 = vector.extract_strided_slice %36 {offsets = [5, 0], sizes = [1, 32], strides = [1, 1]} : vector<6x32xf32> to vector<1x32xf32>
    %43 = arith.index_cast %c0_i32 : i32 to index
    %c0_24 = arith.constant 0 : index
    %c0_25 = arith.constant 0 : index
    %44 = vector.load %arg6[%43, %c0_24, %c0_25] : memref<2x32x96xf32, #tpu.memory_space<vmem>>, vector<1x32x96xf32>
    %45 = vector.shape_cast %44 : vector<1x32x96xf32> to vector<32x96xf32>
    %46 = arith.index_cast %c0_i32 : i32 to index
    %c0_26 = arith.constant 0 : index
    %c0_27 = arith.constant 0 : index
    %47 = vector.load %arg11[%46, %c0_26, %c0_27] : memref<2x1x96xf32, #tpu.memory_space<vmem>>, vector<1x1x96xf32>
    %48 = vector.shape_cast %47 : vector<1x1x96xf32> to vector<1x96xf32>
    %49 = arith.index_cast %c0_i32 : i32 to index
    %c0_28 = arith.constant 0 : index
    %c0_29 = arith.constant 0 : index
    %50 = vector.load %arg7[%49, %c0_28, %c0_29] : memref<2x32x32xf32, #tpu.memory_space<vmem>>, vector<1x32x32xf32>
    %51 = vector.shape_cast %50 : vector<1x32x32xf32> to vector<32x32xf32>
    %52 = arith.index_cast %c0_i32 : i32 to index
    %c0_30 = arith.constant 0 : index
    %c0_31 = arith.constant 0 : index
    %53 = vector.load %arg8[%52, %c0_30, %c0_31] : memref<2x32x64xf32, #tpu.memory_space<vmem>>, vector<1x32x64xf32>
    %54 = vector.shape_cast %53 : vector<1x32x64xf32> to vector<32x64xf32>
    %55 = arith.index_cast %c0_i32 : i32 to index
    %c0_32 = arith.constant 0 : index
    %c0_33 = arith.constant 0 : index
    %56 = vector.load %arg12[%55, %c0_32, %c0_33] : memref<2x1x64xf32, #tpu.memory_space<vmem>>, vector<1x1x64xf32>
    %57 = vector.shape_cast %56 : vector<1x1x64xf32> to vector<1x64xf32>
    %58 = arith.index_cast %c0_i32 : i32 to index
    %c0_34 = arith.constant 0 : index
    %c0_35 = arith.constant 0 : index
    %59 = vector.load %arg9[%58, %c0_34, %c0_35] : memref<2x64x32xf32, #tpu.memory_space<vmem>>, vector<1x64x32xf32>
    %60 = vector.shape_cast %59 : vector<1x64x32xf32> to vector<64x32xf32>
    %cst_36 = arith.constant dense<0.000000e+00> : vector<5xf32>
    %61 = vector.multi_reduction <add>, %33, %cst_36 [1] : vector<5x32xf32> to vector<5xf32>
    %62 = vector.shape_cast %61 : vector<5xf32> to vector<5x1xf32>
    %cst_37 = arith.constant 3.200000e+01 : f32
    %63 = vector.broadcast %cst_37 : f32 to vector<5x1xf32>
    %64 = arith.divf %62, %63 : vector<5x1xf32>
    %65 = vector.broadcast %64 : vector<5x1xf32> to vector<5x32xf32>
    %66 = arith.subf %33, %65 : vector<5x32xf32>
    %67 = arith.mulf %66, %66 : vector<5x32xf32>
    %cst_38 = arith.constant dense<0.000000e+00> : vector<5xf32>
    %68 = vector.multi_reduction <add>, %67, %cst_38 [1] : vector<5x32xf32> to vector<5xf32>
    %69 = vector.shape_cast %68 : vector<5xf32> to vector<5x1xf32>
    %cst_39 = arith.constant 3.200000e+01 : f32
    %70 = vector.broadcast %cst_39 : f32 to vector<5x1xf32>
    %71 = arith.divf %69, %70 : vector<5x1xf32>
    %72 = vector.broadcast %64 : vector<5x1xf32> to vector<5x32xf32>
    %73 = arith.subf %33, %72 : vector<5x32xf32>
    %cst_40 = arith.constant 9.99999974E-6 : f32
    %74 = vector.broadcast %cst_40 : f32 to vector<5x1xf32>
    %75 = arith.addf %71, %74 : vector<5x1xf32>
    %76 = math.rsqrt %75 : vector<5x1xf32>
    %77 = vector.broadcast %76 : vector<5x1xf32> to vector<5x32xf32>
    %78 = arith.mulf %73, %77 : vector<5x32xf32>
    %79 = vector.broadcast %37 : vector<1x32xf32> to vector<5x32xf32>
    %80 = arith.mulf %78, %79 : vector<5x32xf32>
    %81 = vector.broadcast %38 : vector<1x32xf32> to vector<5x32xf32>
    %82 = arith.addf %80, %81 : vector<5x32xf32>
    %cst_41 = arith.constant dense<0.000000e+00> : vector<5x96xf32>
    %83 = tpu.matmul %82, %45, %cst_41 {dimension_numbers = #tpu.dot_dimension_numbers<[1], [0], [0], [1], [0, 0, 1, 1], [], []>} : vector<5x32xf32>, vector<32x96xf32>, vector<5x96xf32> -> vector<5x96xf32>
    %84 = vector.broadcast %48 : vector<1x96xf32> to vector<5x96xf32>
    %85 = arith.addf %83, %84 : vector<5x96xf32>
    %cst_42 = arith.constant 0.000000e+00 : f32
    %86 = vector.broadcast %cst_42 : f32 to vector<5x32xf32>
    %87 = vector.extract_strided_slice %85 {offsets = [0, 0], sizes = [5, 8], strides = [1, 1]} : vector<5x96xf32> to vector<5x8xf32>
    %88 = vector.extract_strided_slice %85 {offsets = [0, 32], sizes = [5, 8], strides = [1, 1]} : vector<5x96xf32> to vector<5x8xf32>
    %89 = vector.extract_strided_slice %85 {offsets = [0, 64], sizes = [5, 8], strides = [1, 1]} : vector<5x96xf32> to vector<5x8xf32>
    %90 = tpu.transpose %88, [1, 0] : vector<5x8xf32> -> vector<8x5xf32>
    %cst_43 = arith.constant dense<0.000000e+00> : vector<5x5xf32>
    %91 = tpu.matmul %87, %90, %cst_43 {dimension_numbers = #tpu.dot_dimension_numbers<[1], [0], [0], [1], [0, 0, 1, 1], [], []>} : vector<5x8xf32>, vector<8x5xf32>, vector<5x5xf32> -> vector<5x5xf32>
    %cst_44 = arith.constant dense<0xFF800000> : vector<5xf32>
    %92 = vector.multi_reduction <maximumf>, %91, %cst_44 [1] : vector<5x5xf32> to vector<5xf32>
    %93 = vector.shape_cast %92 : vector<5xf32> to vector<5x1xf32>
    %94 = vector.broadcast %93 : vector<5x1xf32> to vector<5x5xf32>
    %95 = arith.subf %91, %94 : vector<5x5xf32>
    %96 = math.exp %95 : vector<5x5xf32>
    %cst_45 = arith.constant dense<0.000000e+00> : vector<5xf32>
    %97 = vector.multi_reduction <add>, %96, %cst_45 [1] : vector<5x5xf32> to vector<5xf32>
    %98 = vector.shape_cast %97 : vector<5xf32> to vector<5x1xf32>
    %99 = vector.broadcast %98 : vector<5x1xf32> to vector<5x5xf32>
    %100 = arith.divf %96, %99 : vector<5x5xf32>
    %cst_46 = arith.constant dense<0.000000e+00> : vector<5x8xf32>
    %101 = tpu.matmul %100, %89, %cst_46 {dimension_numbers = #tpu.dot_dimension_numbers<[1], [0], [0], [1], [0, 0, 1, 1], [], []>} : vector<5x5xf32>, vector<5x8xf32>, vector<5x8xf32> -> vector<5x8xf32>
    %102 = vector.extract_strided_slice %51 {offsets = [0, 0], sizes = [8, 32], strides = [1, 1]} : vector<32x32xf32> to vector<8x32xf32>
    %cst_47 = arith.constant dense<0.000000e+00> : vector<5x32xf32>
    %103 = tpu.matmul %101, %102, %cst_47 {dimension_numbers = #tpu.dot_dimension_numbers<[1], [0], [0], [1], [0, 0, 1, 1], [], []>} : vector<5x8xf32>, vector<8x32xf32>, vector<5x32xf32> -> vector<5x32xf32>
    %104 = arith.addf %86, %103 : vector<5x32xf32>
    %105 = vector.extract_strided_slice %85 {offsets = [0, 8], sizes = [5, 8], strides = [1, 1]} : vector<5x96xf32> to vector<5x8xf32>
    %106 = vector.extract_strided_slice %85 {offsets = [0, 40], sizes = [5, 8], strides = [1, 1]} : vector<5x96xf32> to vector<5x8xf32>
    %107 = vector.extract_strided_slice %85 {offsets = [0, 72], sizes = [5, 8], strides = [1, 1]} : vector<5x96xf32> to vector<5x8xf32>
    %108 = tpu.transpose %106, [1, 0] : vector<5x8xf32> -> vector<8x5xf32>
    %cst_48 = arith.constant dense<0.000000e+00> : vector<5x5xf32>
    %109 = tpu.matmul %105, %108, %cst_48 {dimension_numbers = #tpu.dot_dimension_numbers<[1], [0], [0], [1], [0, 0, 1, 1], [], []>} : vector<5x8xf32>, vector<8x5xf32>, vector<5x5xf32> -> vector<5x5xf32>
    %cst_49 = arith.constant dense<0xFF800000> : vector<5xf32>
    %110 = vector.multi_reduction <maximumf>, %109, %cst_49 [1] : vector<5x5xf32> to vector<5xf32>
    %111 = vector.shape_cast %110 : vector<5xf32> to vector<5x1xf32>
    %112 = vector.broadcast %111 : vector<5x1xf32> to vector<5x5xf32>
    %113 = arith.subf %109, %112 : vector<5x5xf32>
    %114 = math.exp %113 : vector<5x5xf32>
    %cst_50 = arith.constant dense<0.000000e+00> : vector<5xf32>
    %115 = vector.multi_reduction <add>, %114, %cst_50 [1] : vector<5x5xf32> to vector<5xf32>
    %116 = vector.shape_cast %115 : vector<5xf32> to vector<5x1xf32>
    %117 = vector.broadcast %116 : vector<5x1xf32> to vector<5x5xf32>
    %118 = arith.divf %114, %117 : vector<5x5xf32>
    %cst_51 = arith.constant dense<0.000000e+00> : vector<5x8xf32>
    %119 = tpu.matmul %118, %107, %cst_51 {dimension_numbers = #tpu.dot_dimension_numbers<[1], [0], [0], [1], [0, 0, 1, 1], [], []>} : vector<5x5xf32>, vector<5x8xf32>, vector<5x8xf32> -> vector<5x8xf32>
    %120 = vector.extract_strided_slice %51 {offsets = [8, 0], sizes = [8, 32], strides = [1, 1]} : vector<32x32xf32> to vector<8x32xf32>
    %cst_52 = arith.constant dense<0.000000e+00> : vector<5x32xf32>
    %121 = tpu.matmul %119, %120, %cst_52 {dimension_numbers = #tpu.dot_dimension_numbers<[1], [0], [0], [1], [0, 0, 1, 1], [], []>} : vector<5x8xf32>, vector<8x32xf32>, vector<5x32xf32> -> vector<5x32xf32>
    %122 = arith.addf %104, %121 : vector<5x32xf32>
    %123 = vector.extract_strided_slice %85 {offsets = [0, 16], sizes = [5, 8], strides = [1, 1]} : vector<5x96xf32> to vector<5x8xf32>
    %124 = vector.extract_strided_slice %85 {offsets = [0, 48], sizes = [5, 8], strides = [1, 1]} : vector<5x96xf32> to vector<5x8xf32>
    %125 = vector.extract_strided_slice %85 {offsets = [0, 80], sizes = [5, 8], strides = [1, 1]} : vector<5x96xf32> to vector<5x8xf32>
    %126 = tpu.transpose %124, [1, 0] : vector<5x8xf32> -> vector<8x5xf32>
    %cst_53 = arith.constant dense<0.000000e+00> : vector<5x5xf32>
    %127 = tpu.matmul %123, %126, %cst_53 {dimension_numbers = #tpu.dot_dimension_numbers<[1], [0], [0], [1], [0, 0, 1, 1], [], []>} : vector<5x8xf32>, vector<8x5xf32>, vector<5x5xf32> -> vector<5x5xf32>
    %cst_54 = arith.constant dense<0xFF800000> : vector<5xf32>
    %128 = vector.multi_reduction <maximumf>, %127, %cst_54 [1] : vector<5x5xf32> to vector<5xf32>
    %129 = vector.shape_cast %128 : vector<5xf32> to vector<5x1xf32>
    %130 = vector.broadcast %129 : vector<5x1xf32> to vector<5x5xf32>
    %131 = arith.subf %127, %130 : vector<5x5xf32>
    %132 = math.exp %131 : vector<5x5xf32>
    %cst_55 = arith.constant dense<0.000000e+00> : vector<5xf32>
    %133 = vector.multi_reduction <add>, %132, %cst_55 [1] : vector<5x5xf32> to vector<5xf32>
    %134 = vector.shape_cast %133 : vector<5xf32> to vector<5x1xf32>
    %135 = vector.broadcast %134 : vector<5x1xf32> to vector<5x5xf32>
    %136 = arith.divf %132, %135 : vector<5x5xf32>
    %cst_56 = arith.constant dense<0.000000e+00> : vector<5x8xf32>
    %137 = tpu.matmul %136, %125, %cst_56 {dimension_numbers = #tpu.dot_dimension_numbers<[1], [0], [0], [1], [0, 0, 1, 1], [], []>} : vector<5x5xf32>, vector<5x8xf32>, vector<5x8xf32> -> vector<5x8xf32>
    %138 = vector.extract_strided_slice %51 {offsets = [16, 0], sizes = [8, 32], strides = [1, 1]} : vector<32x32xf32> to vector<8x32xf32>
    %cst_57 = arith.constant dense<0.000000e+00> : vector<5x32xf32>
    %139 = tpu.matmul %137, %138, %cst_57 {dimension_numbers = #tpu.dot_dimension_numbers<[1], [0], [0], [1], [0, 0, 1, 1], [], []>} : vector<5x8xf32>, vector<8x32xf32>, vector<5x32xf32> -> vector<5x32xf32>
    %140 = arith.addf %122, %139 : vector<5x32xf32>
    %141 = vector.extract_strided_slice %85 {offsets = [0, 24], sizes = [5, 8], strides = [1, 1]} : vector<5x96xf32> to vector<5x8xf32>
    %142 = vector.extract_strided_slice %85 {offsets = [0, 56], sizes = [5, 8], strides = [1, 1]} : vector<5x96xf32> to vector<5x8xf32>
    %143 = vector.extract_strided_slice %85 {offsets = [0, 88], sizes = [5, 8], strides = [1, 1]} : vector<5x96xf32> to vector<5x8xf32>
    %144 = tpu.transpose %142, [1, 0] : vector<5x8xf32> -> vector<8x5xf32>
    %cst_58 = arith.constant dense<0.000000e+00> : vector<5x5xf32>
    %145 = tpu.matmul %141, %144, %cst_58 {dimension_numbers = #tpu.dot_dimension_numbers<[1], [0], [0], [1], [0, 0, 1, 1], [], []>} : vector<5x8xf32>, vector<8x5xf32>, vector<5x5xf32> -> vector<5x5xf32>
    %cst_59 = arith.constant dense<0xFF800000> : vector<5xf32>
    %146 = vector.multi_reduction <maximumf>, %145, %cst_59 [1] : vector<5x5xf32> to vector<5xf32>
    %147 = vector.shape_cast %146 : vector<5xf32> to vector<5x1xf32>
    %148 = vector.broadcast %147 : vector<5x1xf32> to vector<5x5xf32>
    %149 = arith.subf %145, %148 : vector<5x5xf32>
    %150 = math.exp %149 : vector<5x5xf32>
    %cst_60 = arith.constant dense<0.000000e+00> : vector<5xf32>
    %151 = vector.multi_reduction <add>, %150, %cst_60 [1] : vector<5x5xf32> to vector<5xf32>
    %152 = vector.shape_cast %151 : vector<5xf32> to vector<5x1xf32>
    %153 = vector.broadcast %152 : vector<5x1xf32> to vector<5x5xf32>
    %154 = arith.divf %150, %153 : vector<5x5xf32>
    %cst_61 = arith.constant dense<0.000000e+00> : vector<5x8xf32>
    %155 = tpu.matmul %154, %143, %cst_61 {dimension_numbers = #tpu.dot_dimension_numbers<[1], [0], [0], [1], [0, 0, 1, 1], [], []>} : vector<5x5xf32>, vector<5x8xf32>, vector<5x8xf32> -> vector<5x8xf32>
    %156 = vector.extract_strided_slice %51 {offsets = [24, 0], sizes = [8, 32], strides = [1, 1]} : vector<32x32xf32> to vector<8x32xf32>
    %cst_62 = arith.constant dense<0.000000e+00> : vector<5x32xf32>
    %157 = tpu.matmul %155, %156, %cst_62 {dimension_numbers = #tpu.dot_dimension_numbers<[1], [0], [0], [1], [0, 0, 1, 1], [], []>} : vector<5x8xf32>, vector<8x32xf32>, vector<5x32xf32> -> vector<5x32xf32>
    %158 = arith.addf %140, %157 : vector<5x32xf32>
    %159 = arith.addf %33, %158 : vector<5x32xf32>
    %160 = vector.broadcast %41 : vector<1x32xf32> to vector<5x32xf32>
    %161 = arith.addf %159, %160 : vector<5x32xf32>
    %cst_63 = arith.constant dense<0.000000e+00> : vector<5xf32>
    %162 = vector.multi_reduction <add>, %161, %cst_63 [1] : vector<5x32xf32> to vector<5xf32>
    %163 = vector.shape_cast %162 : vector<5xf32> to vector<5x1xf32>
    %cst_64 = arith.constant 3.200000e+01 : f32
    %164 = vector.broadcast %cst_64 : f32 to vector<5x1xf32>
    %165 = arith.divf %163, %164 : vector<5x1xf32>
    %166 = vector.broadcast %165 : vector<5x1xf32> to vector<5x32xf32>
    %167 = arith.subf %161, %166 : vector<5x32xf32>
    %168 = arith.mulf %167, %167 : vector<5x32xf32>
    %cst_65 = arith.constant dense<0.000000e+00> : vector<5xf32>
    %169 = vector.multi_reduction <add>, %168, %cst_65 [1] : vector<5x32xf32> to vector<5xf32>
    %170 = vector.shape_cast %169 : vector<5xf32> to vector<5x1xf32>
    %cst_66 = arith.constant 3.200000e+01 : f32
    %171 = vector.broadcast %cst_66 : f32 to vector<5x1xf32>
    %172 = arith.divf %170, %171 : vector<5x1xf32>
    %173 = vector.broadcast %165 : vector<5x1xf32> to vector<5x32xf32>
    %174 = arith.subf %161, %173 : vector<5x32xf32>
    %cst_67 = arith.constant 9.99999974E-6 : f32
    %175 = vector.broadcast %cst_67 : f32 to vector<5x1xf32>
    %176 = arith.addf %172, %175 : vector<5x1xf32>
    %177 = math.rsqrt %176 : vector<5x1xf32>
    %178 = vector.broadcast %177 : vector<5x1xf32> to vector<5x32xf32>
    %179 = arith.mulf %174, %178 : vector<5x32xf32>
    %180 = vector.broadcast %39 : vector<1x32xf32> to vector<5x32xf32>
    %181 = arith.mulf %179, %180 : vector<5x32xf32>
    %182 = vector.broadcast %40 : vector<1x32xf32> to vector<5x32xf32>
    %183 = arith.addf %181, %182 : vector<5x32xf32>
    %cst_68 = arith.constant dense<0.000000e+00> : vector<5x64xf32>
    %184 = tpu.matmul %183, %54, %cst_68 {dimension_numbers = #tpu.dot_dimension_numbers<[1], [0], [0], [1], [0, 0, 1, 1], [], []>} : vector<5x32xf32>, vector<32x64xf32>, vector<5x64xf32> -> vector<5x64xf32>
    %185 = vector.broadcast %57 : vector<1x64xf32> to vector<5x64xf32>
    %186 = arith.addf %184, %185 : vector<5x64xf32>
    %cst_69 = arith.constant 1.702000e+00 : f32
    %187 = vector.broadcast %cst_69 : f32 to vector<5x64xf32>
    %188 = arith.mulf %187, %186 : vector<5x64xf32>
    %189 = arith.negf %188 : vector<5x64xf32>
    %190 = math.exp %189 : vector<5x64xf32>
    %cst_70 = arith.constant 1.000000e+00 : f32
    %191 = vector.broadcast %cst_70 : f32 to vector<5x64xf32>
    %192 = arith.addf %191, %190 : vector<5x64xf32>
    %193 = arith.divf %191, %192 : vector<5x64xf32>
    %194 = arith.mulf %186, %193 : vector<5x64xf32>
    %cst_71 = arith.constant dense<0.000000e+00> : vector<5x32xf32>
    %195 = tpu.matmul %194, %60, %cst_71 {dimension_numbers = #tpu.dot_dimension_numbers<[1], [0], [0], [1], [0, 0, 1, 1], [], []>} : vector<5x64xf32>, vector<64x32xf32>, vector<5x32xf32> -> vector<5x32xf32>
    %196 = arith.addf %161, %195 : vector<5x32xf32>
    %197 = vector.broadcast %42 : vector<1x32xf32> to vector<5x32xf32>
    %198 = arith.addf %196, %197 : vector<5x32xf32>
    %c1_i32 = arith.constant 1 : i32
    %199 = arith.index_cast %c1_i32 : i32 to index
    %c0_72 = arith.constant 0 : index
    %c0_73 = arith.constant 0 : index
    %200 = vector.load %arg10[%199, %c0_72, %c0_73] : memref<2x6x32xf32, #tpu.memory_space<vmem>>, vector<1x6x32xf32>
    %201 = vector.shape_cast %200 : vector<1x6x32xf32> to vector<6x32xf32>
    %202 = vector.extract_strided_slice %201 {offsets = [0, 0], sizes = [1, 32], strides = [1, 1]} : vector<6x32xf32> to vector<1x32xf32>
    %203 = vector.extract_strided_slice %201 {offsets = [1, 0], sizes = [1, 32], strides = [1, 1]} : vector<6x32xf32> to vector<1x32xf32>
    %204 = vector.extract_strided_slice %201 {offsets = [2, 0], sizes = [1, 32], strides = [1, 1]} : vector<6x32xf32> to vector<1x32xf32>
    %205 = vector.extract_strided_slice %201 {offsets = [3, 0], sizes = [1, 32], strides = [1, 1]} : vector<6x32xf32> to vector<1x32xf32>
    %206 = vector.extract_strided_slice %201 {offsets = [4, 0], sizes = [1, 32], strides = [1, 1]} : vector<6x32xf32> to vector<1x32xf32>
    %207 = vector.extract_strided_slice %201 {offsets = [5, 0], sizes = [1, 32], strides = [1, 1]} : vector<6x32xf32> to vector<1x32xf32>
    %208 = arith.index_cast %c1_i32 : i32 to index
    %c0_74 = arith.constant 0 : index
    %c0_75 = arith.constant 0 : index
    %209 = vector.load %arg6[%208, %c0_74, %c0_75] : memref<2x32x96xf32, #tpu.memory_space<vmem>>, vector<1x32x96xf32>
    %210 = vector.shape_cast %209 : vector<1x32x96xf32> to vector<32x96xf32>
    %211 = arith.index_cast %c1_i32 : i32 to index
    %c0_76 = arith.constant 0 : index
    %c0_77 = arith.constant 0 : index
    %212 = vector.load %arg11[%211, %c0_76, %c0_77] : memref<2x1x96xf32, #tpu.memory_space<vmem>>, vector<1x1x96xf32>
    %213 = vector.shape_cast %212 : vector<1x1x96xf32> to vector<1x96xf32>
    %214 = arith.index_cast %c1_i32 : i32 to index
    %c0_78 = arith.constant 0 : index
    %c0_79 = arith.constant 0 : index
    %215 = vector.load %arg7[%214, %c0_78, %c0_79] : memref<2x32x32xf32, #tpu.memory_space<vmem>>, vector<1x32x32xf32>
    %216 = vector.shape_cast %215 : vector<1x32x32xf32> to vector<32x32xf32>
    %217 = arith.index_cast %c1_i32 : i32 to index
    %c0_80 = arith.constant 0 : index
    %c0_81 = arith.constant 0 : index
    %218 = vector.load %arg8[%217, %c0_80, %c0_81] : memref<2x32x64xf32, #tpu.memory_space<vmem>>, vector<1x32x64xf32>
    %219 = vector.shape_cast %218 : vector<1x32x64xf32> to vector<32x64xf32>
    %220 = arith.index_cast %c1_i32 : i32 to index
    %c0_82 = arith.constant 0 : index
    %c0_83 = arith.constant 0 : index
    %221 = vector.load %arg12[%220, %c0_82, %c0_83] : memref<2x1x64xf32, #tpu.memory_space<vmem>>, vector<1x1x64xf32>
    %222 = vector.shape_cast %221 : vector<1x1x64xf32> to vector<1x64xf32>
    %223 = arith.index_cast %c1_i32 : i32 to index
    %c0_84 = arith.constant 0 : index
    %c0_85 = arith.constant 0 : index
    %224 = vector.load %arg9[%223, %c0_84, %c0_85] : memref<2x64x32xf32, #tpu.memory_space<vmem>>, vector<1x64x32xf32>
    %225 = vector.shape_cast %224 : vector<1x64x32xf32> to vector<64x32xf32>
    %cst_86 = arith.constant dense<0.000000e+00> : vector<5xf32>
    %226 = vector.multi_reduction <add>, %198, %cst_86 [1] : vector<5x32xf32> to vector<5xf32>
    %227 = vector.shape_cast %226 : vector<5xf32> to vector<5x1xf32>
    %cst_87 = arith.constant 3.200000e+01 : f32
    %228 = vector.broadcast %cst_87 : f32 to vector<5x1xf32>
    %229 = arith.divf %227, %228 : vector<5x1xf32>
    %230 = vector.broadcast %229 : vector<5x1xf32> to vector<5x32xf32>
    %231 = arith.subf %198, %230 : vector<5x32xf32>
    %232 = arith.mulf %231, %231 : vector<5x32xf32>
    %cst_88 = arith.constant dense<0.000000e+00> : vector<5xf32>
    %233 = vector.multi_reduction <add>, %232, %cst_88 [1] : vector<5x32xf32> to vector<5xf32>
    %234 = vector.shape_cast %233 : vector<5xf32> to vector<5x1xf32>
    %cst_89 = arith.constant 3.200000e+01 : f32
    %235 = vector.broadcast %cst_89 : f32 to vector<5x1xf32>
    %236 = arith.divf %234, %235 : vector<5x1xf32>
    %237 = vector.broadcast %229 : vector<5x1xf32> to vector<5x32xf32>
    %238 = arith.subf %198, %237 : vector<5x32xf32>
    %cst_90 = arith.constant 9.99999974E-6 : f32
    %239 = vector.broadcast %cst_90 : f32 to vector<5x1xf32>
    %240 = arith.addf %236, %239 : vector<5x1xf32>
    %241 = math.rsqrt %240 : vector<5x1xf32>
    %242 = vector.broadcast %241 : vector<5x1xf32> to vector<5x32xf32>
    %243 = arith.mulf %238, %242 : vector<5x32xf32>
    %244 = vector.broadcast %202 : vector<1x32xf32> to vector<5x32xf32>
    %245 = arith.mulf %243, %244 : vector<5x32xf32>
    %246 = vector.broadcast %203 : vector<1x32xf32> to vector<5x32xf32>
    %247 = arith.addf %245, %246 : vector<5x32xf32>
    %cst_91 = arith.constant dense<0.000000e+00> : vector<5x96xf32>
    %248 = tpu.matmul %247, %210, %cst_91 {dimension_numbers = #tpu.dot_dimension_numbers<[1], [0], [0], [1], [0, 0, 1, 1], [], []>} : vector<5x32xf32>, vector<32x96xf32>, vector<5x96xf32> -> vector<5x96xf32>
    %249 = vector.broadcast %213 : vector<1x96xf32> to vector<5x96xf32>
    %250 = arith.addf %248, %249 : vector<5x96xf32>
    %cst_92 = arith.constant 0.000000e+00 : f32
    %251 = vector.broadcast %cst_92 : f32 to vector<5x32xf32>
    %252 = vector.extract_strided_slice %250 {offsets = [0, 0], sizes = [5, 8], strides = [1, 1]} : vector<5x96xf32> to vector<5x8xf32>
    %253 = vector.extract_strided_slice %250 {offsets = [0, 32], sizes = [5, 8], strides = [1, 1]} : vector<5x96xf32> to vector<5x8xf32>
    %254 = vector.extract_strided_slice %250 {offsets = [0, 64], sizes = [5, 8], strides = [1, 1]} : vector<5x96xf32> to vector<5x8xf32>
    %255 = tpu.transpose %253, [1, 0] : vector<5x8xf32> -> vector<8x5xf32>
    %cst_93 = arith.constant dense<0.000000e+00> : vector<5x5xf32>
    %256 = tpu.matmul %252, %255, %cst_93 {dimension_numbers = #tpu.dot_dimension_numbers<[1], [0], [0], [1], [0, 0, 1, 1], [], []>} : vector<5x8xf32>, vector<8x5xf32>, vector<5x5xf32> -> vector<5x5xf32>
    %cst_94 = arith.constant dense<0xFF800000> : vector<5xf32>
    %257 = vector.multi_reduction <maximumf>, %256, %cst_94 [1] : vector<5x5xf32> to vector<5xf32>
    %258 = vector.shape_cast %257 : vector<5xf32> to vector<5x1xf32>
    %259 = vector.broadcast %258 : vector<5x1xf32> to vector<5x5xf32>
    %260 = arith.subf %256, %259 : vector<5x5xf32>
    %261 = math.exp %260 : vector<5x5xf32>
    %cst_95 = arith.constant dense<0.000000e+00> : vector<5xf32>
    %262 = vector.multi_reduction <add>, %261, %cst_95 [1] : vector<5x5xf32> to vector<5xf32>
    %263 = vector.shape_cast %262 : vector<5xf32> to vector<5x1xf32>
    %264 = vector.broadcast %263 : vector<5x1xf32> to vector<5x5xf32>
    %265 = arith.divf %261, %264 : vector<5x5xf32>
    %cst_96 = arith.constant dense<0.000000e+00> : vector<5x8xf32>
    %266 = tpu.matmul %265, %254, %cst_96 {dimension_numbers = #tpu.dot_dimension_numbers<[1], [0], [0], [1], [0, 0, 1, 1], [], []>} : vector<5x5xf32>, vector<5x8xf32>, vector<5x8xf32> -> vector<5x8xf32>
    %267 = vector.extract_strided_slice %216 {offsets = [0, 0], sizes = [8, 32], strides = [1, 1]} : vector<32x32xf32> to vector<8x32xf32>
    %cst_97 = arith.constant dense<0.000000e+00> : vector<5x32xf32>
    %268 = tpu.matmul %266, %267, %cst_97 {dimension_numbers = #tpu.dot_dimension_numbers<[1], [0], [0], [1], [0, 0, 1, 1], [], []>} : vector<5x8xf32>, vector<8x32xf32>, vector<5x32xf32> -> vector<5x32xf32>
    %269 = arith.addf %251, %268 : vector<5x32xf32>
    %270 = vector.extract_strided_slice %250 {offsets = [0, 8], sizes = [5, 8], strides = [1, 1]} : vector<5x96xf32> to vector<5x8xf32>
    %271 = vector.extract_strided_slice %250 {offsets = [0, 40], sizes = [5, 8], strides = [1, 1]} : vector<5x96xf32> to vector<5x8xf32>
    %272 = vector.extract_strided_slice %250 {offsets = [0, 72], sizes = [5, 8], strides = [1, 1]} : vector<5x96xf32> to vector<5x8xf32>
    %273 = tpu.transpose %271, [1, 0] : vector<5x8xf32> -> vector<8x5xf32>
    %cst_98 = arith.constant dense<0.000000e+00> : vector<5x5xf32>
    %274 = tpu.matmul %270, %273, %cst_98 {dimension_numbers = #tpu.dot_dimension_numbers<[1], [0], [0], [1], [0, 0, 1, 1], [], []>} : vector<5x8xf32>, vector<8x5xf32>, vector<5x5xf32> -> vector<5x5xf32>
    %cst_99 = arith.constant dense<0xFF800000> : vector<5xf32>
    %275 = vector.multi_reduction <maximumf>, %274, %cst_99 [1] : vector<5x5xf32> to vector<5xf32>
    %276 = vector.shape_cast %275 : vector<5xf32> to vector<5x1xf32>
    %277 = vector.broadcast %276 : vector<5x1xf32> to vector<5x5xf32>
    %278 = arith.subf %274, %277 : vector<5x5xf32>
    %279 = math.exp %278 : vector<5x5xf32>
    %cst_100 = arith.constant dense<0.000000e+00> : vector<5xf32>
    %280 = vector.multi_reduction <add>, %279, %cst_100 [1] : vector<5x5xf32> to vector<5xf32>
    %281 = vector.shape_cast %280 : vector<5xf32> to vector<5x1xf32>
    %282 = vector.broadcast %281 : vector<5x1xf32> to vector<5x5xf32>
    %283 = arith.divf %279, %282 : vector<5x5xf32>
    %cst_101 = arith.constant dense<0.000000e+00> : vector<5x8xf32>
    %284 = tpu.matmul %283, %272, %cst_101 {dimension_numbers = #tpu.dot_dimension_numbers<[1], [0], [0], [1], [0, 0, 1, 1], [], []>} : vector<5x5xf32>, vector<5x8xf32>, vector<5x8xf32> -> vector<5x8xf32>
    %285 = vector.extract_strided_slice %216 {offsets = [8, 0], sizes = [8, 32], strides = [1, 1]} : vector<32x32xf32> to vector<8x32xf32>
    %cst_102 = arith.constant dense<0.000000e+00> : vector<5x32xf32>
    %286 = tpu.matmul %284, %285, %cst_102 {dimension_numbers = #tpu.dot_dimension_numbers<[1], [0], [0], [1], [0, 0, 1, 1], [], []>} : vector<5x8xf32>, vector<8x32xf32>, vector<5x32xf32> -> vector<5x32xf32>
    %287 = arith.addf %269, %286 : vector<5x32xf32>
    %288 = vector.extract_strided_slice %250 {offsets = [0, 16], sizes = [5, 8], strides = [1, 1]} : vector<5x96xf32> to vector<5x8xf32>
    %289 = vector.extract_strided_slice %250 {offsets = [0, 48], sizes = [5, 8], strides = [1, 1]} : vector<5x96xf32> to vector<5x8xf32>
    %290 = vector.extract_strided_slice %250 {offsets = [0, 80], sizes = [5, 8], strides = [1, 1]} : vector<5x96xf32> to vector<5x8xf32>
    %291 = tpu.transpose %289, [1, 0] : vector<5x8xf32> -> vector<8x5xf32>
    %cst_103 = arith.constant dense<0.000000e+00> : vector<5x5xf32>
    %292 = tpu.matmul %288, %291, %cst_103 {dimension_numbers = #tpu.dot_dimension_numbers<[1], [0], [0], [1], [0, 0, 1, 1], [], []>} : vector<5x8xf32>, vector<8x5xf32>, vector<5x5xf32> -> vector<5x5xf32>
    %cst_104 = arith.constant dense<0xFF800000> : vector<5xf32>
    %293 = vector.multi_reduction <maximumf>, %292, %cst_104 [1] : vector<5x5xf32> to vector<5xf32>
    %294 = vector.shape_cast %293 : vector<5xf32> to vector<5x1xf32>
    %295 = vector.broadcast %294 : vector<5x1xf32> to vector<5x5xf32>
    %296 = arith.subf %292, %295 : vector<5x5xf32>
    %297 = math.exp %296 : vector<5x5xf32>
    %cst_105 = arith.constant dense<0.000000e+00> : vector<5xf32>
    %298 = vector.multi_reduction <add>, %297, %cst_105 [1] : vector<5x5xf32> to vector<5xf32>
    %299 = vector.shape_cast %298 : vector<5xf32> to vector<5x1xf32>
    %300 = vector.broadcast %299 : vector<5x1xf32> to vector<5x5xf32>
    %301 = arith.divf %297, %300 : vector<5x5xf32>
    %cst_106 = arith.constant dense<0.000000e+00> : vector<5x8xf32>
    %302 = tpu.matmul %301, %290, %cst_106 {dimension_numbers = #tpu.dot_dimension_numbers<[1], [0], [0], [1], [0, 0, 1, 1], [], []>} : vector<5x5xf32>, vector<5x8xf32>, vector<5x8xf32> -> vector<5x8xf32>
    %303 = vector.extract_strided_slice %216 {offsets = [16, 0], sizes = [8, 32], strides = [1, 1]} : vector<32x32xf32> to vector<8x32xf32>
    %cst_107 = arith.constant dense<0.000000e+00> : vector<5x32xf32>
    %304 = tpu.matmul %302, %303, %cst_107 {dimension_numbers = #tpu.dot_dimension_numbers<[1], [0], [0], [1], [0, 0, 1, 1], [], []>} : vector<5x8xf32>, vector<8x32xf32>, vector<5x32xf32> -> vector<5x32xf32>
    %305 = arith.addf %287, %304 : vector<5x32xf32>
    %306 = vector.extract_strided_slice %250 {offsets = [0, 24], sizes = [5, 8], strides = [1, 1]} : vector<5x96xf32> to vector<5x8xf32>
    %307 = vector.extract_strided_slice %250 {offsets = [0, 56], sizes = [5, 8], strides = [1, 1]} : vector<5x96xf32> to vector<5x8xf32>
    %308 = vector.extract_strided_slice %250 {offsets = [0, 88], sizes = [5, 8], strides = [1, 1]} : vector<5x96xf32> to vector<5x8xf32>
    %309 = tpu.transpose %307, [1, 0] : vector<5x8xf32> -> vector<8x5xf32>
    %cst_108 = arith.constant dense<0.000000e+00> : vector<5x5xf32>
    %310 = tpu.matmul %306, %309, %cst_108 {dimension_numbers = #tpu.dot_dimension_numbers<[1], [0], [0], [1], [0, 0, 1, 1], [], []>} : vector<5x8xf32>, vector<8x5xf32>, vector<5x5xf32> -> vector<5x5xf32>
    %cst_109 = arith.constant dense<0xFF800000> : vector<5xf32>
    %311 = vector.multi_reduction <maximumf>, %310, %cst_109 [1] : vector<5x5xf32> to vector<5xf32>
    %312 = vector.shape_cast %311 : vector<5xf32> to vector<5x1xf32>
    %313 = vector.broadcast %312 : vector<5x1xf32> to vector<5x5xf32>
    %314 = arith.subf %310, %313 : vector<5x5xf32>
    %315 = math.exp %314 : vector<5x5xf32>
    %cst_110 = arith.constant dense<0.000000e+00> : vector<5xf32>
    %316 = vector.multi_reduction <add>, %315, %cst_110 [1] : vector<5x5xf32> to vector<5xf32>
    %317 = vector.shape_cast %316 : vector<5xf32> to vector<5x1xf32>
    %318 = vector.broadcast %317 : vector<5x1xf32> to vector<5x5xf32>
    %319 = arith.divf %315, %318 : vector<5x5xf32>
    %cst_111 = arith.constant dense<0.000000e+00> : vector<5x8xf32>
    %320 = tpu.matmul %319, %308, %cst_111 {dimension_numbers = #tpu.dot_dimension_numbers<[1], [0], [0], [1], [0, 0, 1, 1], [], []>} : vector<5x5xf32>, vector<5x8xf32>, vector<5x8xf32> -> vector<5x8xf32>
    %321 = vector.extract_strided_slice %216 {offsets = [24, 0], sizes = [8, 32], strides = [1, 1]} : vector<32x32xf32> to vector<8x32xf32>
    %cst_112 = arith.constant dense<0.000000e+00> : vector<5x32xf32>
    %322 = tpu.matmul %320, %321, %cst_112 {dimension_numbers = #tpu.dot_dimension_numbers<[1], [0], [0], [1], [0, 0, 1, 1], [], []>} : vector<5x8xf32>, vector<8x32xf32>, vector<5x32xf32> -> vector<5x32xf32>
    %323 = arith.addf %305, %322 : vector<5x32xf32>
    %324 = arith.addf %198, %323 : vector<5x32xf32>
    %325 = vector.broadcast %206 : vector<1x32xf32> to vector<5x32xf32>
    %326 = arith.addf %324, %325 : vector<5x32xf32>
    %cst_113 = arith.constant dense<0.000000e+00> : vector<5xf32>
    %327 = vector.multi_reduction <add>, %326, %cst_113 [1] : vector<5x32xf32> to vector<5xf32>
    %328 = vector.shape_cast %327 : vector<5xf32> to vector<5x1xf32>
    %cst_114 = arith.constant 3.200000e+01 : f32
    %329 = vector.broadcast %cst_114 : f32 to vector<5x1xf32>
    %330 = arith.divf %328, %329 : vector<5x1xf32>
    %331 = vector.broadcast %330 : vector<5x1xf32> to vector<5x32xf32>
    %332 = arith.subf %326, %331 : vector<5x32xf32>
    %333 = arith.mulf %332, %332 : vector<5x32xf32>
    %cst_115 = arith.constant dense<0.000000e+00> : vector<5xf32>
    %334 = vector.multi_reduction <add>, %333, %cst_115 [1] : vector<5x32xf32> to vector<5xf32>
    %335 = vector.shape_cast %334 : vector<5xf32> to vector<5x1xf32>
    %cst_116 = arith.constant 3.200000e+01 : f32
    %336 = vector.broadcast %cst_116 : f32 to vector<5x1xf32>
    %337 = arith.divf %335, %336 : vector<5x1xf32>
    %338 = vector.broadcast %330 : vector<5x1xf32> to vector<5x32xf32>
    %339 = arith.subf %326, %338 : vector<5x32xf32>
    %cst_117 = arith.constant 9.99999974E-6 : f32
    %340 = vector.broadcast %cst_117 : f32 to vector<5x1xf32>
    %341 = arith.addf %337, %340 : vector<5x1xf32>
    %342 = math.rsqrt %341 : vector<5x1xf32>
    %343 = vector.broadcast %342 : vector<5x1xf32> to vector<5x32xf32>
    %344 = arith.mulf %339, %343 : vector<5x32xf32>
    %345 = vector.broadcast %204 : vector<1x32xf32> to vector<5x32xf32>
    %346 = arith.mulf %344, %345 : vector<5x32xf32>
    %347 = vector.broadcast %205 : vector<1x32xf32> to vector<5x32xf32>
    %348 = arith.addf %346, %347 : vector<5x32xf32>
    %cst_118 = arith.constant dense<0.000000e+00> : vector<5x64xf32>
    %349 = tpu.matmul %348, %219, %cst_118 {dimension_numbers = #tpu.dot_dimension_numbers<[1], [0], [0], [1], [0, 0, 1, 1], [], []>} : vector<5x32xf32>, vector<32x64xf32>, vector<5x64xf32> -> vector<5x64xf32>
    %350 = vector.broadcast %222 : vector<1x64xf32> to vector<5x64xf32>
    %351 = arith.addf %349, %350 : vector<5x64xf32>
    %cst_119 = arith.constant 1.702000e+00 : f32
    %352 = vector.broadcast %cst_119 : f32 to vector<5x64xf32>
    %353 = arith.mulf %352, %351 : vector<5x64xf32>
    %354 = arith.negf %353 : vector<5x64xf32>
    %355 = math.exp %354 : vector<5x64xf32>
    %cst_120 = arith.constant 1.000000e+00 : f32
    %356 = vector.broadcast %cst_120 : f32 to vector<5x64xf32>
    %357 = arith.addf %356, %355 : vector<5x64xf32>
    %358 = arith.divf %356, %357 : vector<5x64xf32>
    %359 = arith.mulf %351, %358 : vector<5x64xf32>
    %cst_121 = arith.constant dense<0.000000e+00> : vector<5x32xf32>
    %360 = tpu.matmul %359, %225, %cst_121 {dimension_numbers = #tpu.dot_dimension_numbers<[1], [0], [0], [1], [0, 0, 1, 1], [], []>} : vector<5x64xf32>, vector<64x32xf32>, vector<5x32xf32> -> vector<5x32xf32>
    %361 = arith.addf %326, %360 : vector<5x32xf32>
    %362 = vector.broadcast %207 : vector<1x32xf32> to vector<5x32xf32>
    %363 = arith.addf %361, %362 : vector<5x32xf32>
    %c2_i32 = arith.constant 2 : i32
    %364 = vector.extract_strided_slice %363 {offsets = [1, 0], sizes = [4, 32], strides = [1, 1]} : vector<5x32xf32> to vector<4x32xf32>
    %c0_122 = arith.constant 0 : index
    %c0_123 = arith.constant 0 : index
    %c0_124 = arith.constant 0 : index
    %365 = vector.load %arg13[%c0_122, %c0_123, %c0_124] : memref<1x4x32xf32, #tpu.memory_space<vmem>>, vector<1x4x32xf32>
    %366 = vector.shape_cast %365 : vector<1x4x32xf32> to vector<4x32xf32>
    %367 = vector.shape_cast %364 : vector<4x32xf32> to vector<1x4x32xf32>
    tpu.vector_store %arg13[%c0_122, %c0_123, %c0_124], %367 {strides = array<i32>} : memref<1x4x32xf32, #tpu.memory_space<vmem>>, vector<1x4x32xf32>,
    return
  }
  func.func @transform_0(%arg0: i32) -> (i32, i32, i32) {
    %c0_i32 = arith.constant 0 : i32
    %c0_i32_0 = arith.constant 0 : i32
    %c0_i32_1 = arith.constant 0 : i32
    return %arg0, %c0_i32, %c0_i32_0 : i32, i32, i32
  }
  func.func @transform_1(%arg0: i32) -> (i32, i32) {
    %c0_i32 = arith.constant 0 : i32
    %c0_i32_0 = arith.constant 0 : i32
    %c0_i32_1 = arith.constant 0 : i32
    return %c0_i32, %c0_i32_0 : i32, i32
  }
  func.func @transform_2(%arg0: i32) -> (i32, i32) {
    %c0_i32 = arith.constant 0 : i32
    %c0_i32_0 = arith.constant 0 : i32
    %c0_i32_1 = arith.constant 0 : i32
    return %c0_i32, %c0_i32_0 : i32, i32
  }
  func.func @transform_3(%arg0: i32) -> (i32, i32) {
    %c0_i32 = arith.constant 0 : i32
    %c0_i32_0 = arith.constant 0 : i32
    %c0_i32_1 = arith.constant 0 : i32
    return %c0_i32, %c0_i32_0 : i32, i32
  }
  func.func @transform_4(%arg0: i32) -> (i32, i32) {
    %c0_i32 = arith.constant 0 : i32
    %c0_i32_0 = arith.constant 0 : i32
    %c0_i32_1 = arith.constant 0 : i32
    return %c0_i32, %c0_i32_0 : i32, i32
  }
  func.func @transform_5(%arg0: i32) -> (i32, i32, i32) {
    %c0_i32 = arith.constant 0 : i32
    %c0_i32_0 = arith.constant 0 : i32
    %c0_i32_1 = arith.constant 0 : i32
    %c0_i32_2 = arith.constant 0 : i32
    return %c0_i32, %c0_i32_0, %c0_i32_1 : i32, i32, i32
  }
  func.func @transform_6(%arg0: i32) -> (i32, i32, i32) {
    %c0_i32 = arith.constant 0 : i32
    %c0_i32_0 = arith.constant 0 : i32
    %c0_i32_1 = arith.constant 0 : i32
    %c0_i32_2 = arith.constant 0 : i32
    return %c0_i32, %c0_i32_0, %c0_i32_1 : i32, i32, i32
  }
  func.func @transform_7(%arg0: i32) -> (i32, i32, i32) {
    %c0_i32 = arith.constant 0 : i32
    %c0_i32_0 = arith.constant 0 : i32
    %c0_i32_1 = arith.constant 0 : i32
    %c0_i32_2 = arith.constant 0 : i32
    return %c0_i32, %c0_i32_0, %c0_i32_1 : i32, i32, i32
  }
  func.func @transform_8(%arg0: i32) -> (i32, i32, i32) {
    %c0_i32 = arith.constant 0 : i32
    %c0_i32_0 = arith.constant 0 : i32
    %c0_i32_1 = arith.constant 0 : i32
    %c0_i32_2 = arith.constant 0 : i32
    return %c0_i32, %c0_i32_0, %c0_i32_1 : i32, i32, i32
  }
  func.func @transform_9(%arg0: i32) -> (i32, i32, i32) {
    %c0_i32 = arith.constant 0 : i32
    %c0_i32_0 = arith.constant 0 : i32
    %c0_i32_1 = arith.constant 0 : i32
    %c0_i32_2 = arith.constant 0 : i32
    return %c0_i32, %c0_i32_0, %c0_i32_1 : i32, i32, i32
  }
  func.func @transform_10(%arg0: i32) -> (i32, i32, i32) {
    %c0_i32 = arith.constant 0 : i32
    %c0_i32_0 = arith.constant 0 : i32
    %c0_i32_1 = arith.constant 0 : i32
    %c0_i32_2 = arith.constant 0 : i32
    return %c0_i32, %c0_i32_0, %c0_i32_1 : i32, i32, i32
  }
  func.func @transform_11(%arg0: i32) -> (i32, i32, i32) {
    %c0_i32 = arith.constant 0 : i32
    %c0_i32_0 = arith.constant 0 : i32
    %c0_i32_1 = arith.constant 0 : i32
    %c0_i32_2 = arith.constant 0 : i32
    return %c0_i32, %c0_i32_0, %c0_i32_1 : i32, i32, i32
  }
  func.func @transform_12(%arg0: i32) -> (i32, i32, i32) {
    %c0_i32 = arith.constant 0 : i32
    %c0_i32_0 = arith.constant 0 : i32
    %c0_i32_1 = arith.constant 0 : i32
    return %arg0, %c0_i32, %c0_i32_0 : i32, i32, i32
  }
}

</mosaic_0001>

<bundles_post_ra>
// kernel: tpu_custom_call.1
= control target key start
LH: loop header
LB: loop body
LE: loop exit
PB: predicated region body
PF: predicated region fallthrough
CT: control target
= control target key end

     0   :  { %17 = vsyncpa [#allocation4], 0  ;;  %s4523_s0 = inlined_call_operand.vmem [shape: f32[2,4,192], index: 0, kind: input, shape index: {}]   ;;  %s4524_s1 = inlined_call_operand.vmem [shape: f32[192,32], index: 1, kind: input, shape index: {}]   ;;  %s4525_s2 = inlined_call_operand.vmem [shape: f32[1,32], index: 2, kind: input, shape index: {}]   ;;  %s4526_s3 = inlined_call_operand.vmem [shape: f32[5,32], index: 3, kind: input, shape index: {}]   ;;  %s4527_s4 = inlined_call_operand.vmem [shape: f32[2,32], index: 4, kind: input, shape index: {}]   ;;  %s4528_s5 = inlined_call_operand.vmem [shape: f32[2,32,96], index: 5, kind: input, shape index: {}]   ;;  %s4529_s6 = inlined_call_operand.vmem [shape: f32[2,32,32], index: 6, kind: input, shape index: {}]   ;;  %s4530_s7 = inlined_call_operand.vmem [shape: f32[2,32,64], index: 7, kind: input, shape index: {}]   ;;  %s4531_s8 = inlined_call_operand.vmem [shape: f32[2,64,32], index: 8, kind: input, shape index: {}]   ;;  %s4532_s9 = inlined_call_operand.vmem [shape: f32[2,6,32], index: 9, kind: input, shape index: {}]   ;;  %s4533_s10 = inlined_call_operand.vmem [shape: f32[2,1,96], index: 10, kind: input, shape index: {}]   ;;  %s4534_s11 = inlined_call_operand.vmem [shape: f32[2,1,64], index: 11, kind: input, shape index: {}]   ;;  %s4535_s12 = inlined_call_operand.hbm [shape: f32[2,4,32], index: 12, kind: output, shape index: {}]  }
   0x1   :  { %19 = vsyncpa [#allocation4 + $0x1], 0  ;;  %s3898_s21 = smov 0   ;;  %s3900_s22 = smov 0  }
   0x2   :  { %s3902_s23 = smov 0   ;;  %s3904_s24 = smov 0  }
   0x3 LB: > { %4546 = sst [smem:[#allocation6_spill]] %s3812_s23  ;;  %s3919_s25 = sadd.s32 4294967295, %s3816_s24   ;;  %s3816_s24 = sphi %s3904_s24, %s4558_s24   ;;  %s3812_s23 = sphi %s3902_s23, %s4560_s23   ;;  %s3808_s22 = sphi %s3900_s22, %s4562_s22   ;;  %s3804_s21 = sphi %s3898_s21, %s4561_s21  }
   0x4   : > { %s3188_s26 = sadd.s32 4294967294, %s3816_s24   ;;  %s3923_s27 = sadd.s32 1, %s3816_s24  }
   0x5   : > { %4547 = sst [smem:[#allocation7_spill]] %s3923_s27  ;;  %s289_s28 = sadd.s32 1, %s3812_s23 }
   0x6   : > { %s286_s29 = ssub.s32 %s3816_s24, %s3923_s27  ;;  %p299_p0 = scmp.ne.s32.totalorder %s3812_s23, %s3808_s22 }
   0x7   : > { %p287_p1 = scmp.eq.s32.totalorder %s286_s29, 0  ;;  %p300_p2 = scmp.eq.s32.totalorder %s3919_s25, 1 }
   0x8   : > { %p305_p3 = scmp.ne.s32.totalorder %s3808_s22, %s3804_s21  ;;  %p306_p4 = scmp.eq.s32.totalorder %s3188_s26, 1 }
   0x9   : > { %s3934_s30 = scalar_select %p287_p1, %s3812_s23, %s289_s28  }
   0xa   : > { %p3936_p5 = por %p300_p2, %p299_p0  ;;  %p3940_p6 = por %p306_p4, %p305_p3 }
   0xb   : > { %4548 = sst [smem:[#allocation8_spill]] %s3934_s30  ;;  %p3191_p7 = scmp.ge.s32.totalorder %s3816_s24, 1 }
   0xc   : > { %p365_p8 = scmp.lt.s32.totalorder %s3816_s24, 3 }
   0xe   : > { %p366_p9 = pnand %p3191_p7, %p365_p8 }
   0xf   : > { %v413_v0 = vld [vmem:[%s4524_s1] sm:$0xff] (!%p366_p9)  ;;  %v414_v1 = vld [vmem:[%s4524_s1 + $0x8] sm:$0xff] (!%p366_p9)  ;;  %v415_v2 = vld [vmem:[%s4524_s1 + $0x10] sm:$0xff] (!%p366_p9)  ;;  %p407_p10 = scmp.lt.s32.totalorder (!%p366_p9), %s3919_s25, 1  ;;  %v3818_v3 = vmov (!%p366_p9), 0.0|0.0   ;;  %vm439_vm0 = vcmask (!%p366_p9), 523264  }
  0x10   : > { %369 = sbr.rel (%p366_p9) target bundleno = 8659 (0x21d3), region = 68  ;;  %3566 = vmatprep.subr.bf16.mxu0 (!%p366_p9), %v3818_v3  ;;  %v3567_v4 = vpack.c.bf16 (!%p366_p9), %v414_v1, %v413_v0  ;;  %v416_v5 = vld [vmem:[%s4524_s1 + $0x18] sm:$0xff] (!%p366_p9)  ;;  %3602 = vmatprep.subr.bf16.mxu1 (!%p366_p9), %v3818_v3  ;;  %v417_v7 = vld [vmem:[%s4524_s1 + $0x20] sm:$0xff] (!%p366_p9)  ;;  %v418_v8 = vld [vmem:[%s4524_s1 + $0x28] sm:$0xff] (!%p366_p9)  ;;  %vm513_vm1 = vcmask (!%p366_p9), 253952   ;;  %vm515_vm2 = vcmask (!%p366_p9), 257024  }
  0x11   : > { %v3570_v6 = vpack.c.bf16 (!%p366_p9), %v416_v5, %v415_v2  ;;  %v3573_v9 = vpack.c.bf16 (!%p366_p9), %v418_v8, %v417_v7  ;;  %v419_v10 = vld [vmem:[%s4524_s1 + $0x30] sm:$0xff] (!%p366_p9)  ;;  %v420_v11 = vld [vmem:[%s4524_s1 + $0x38] sm:$0xff] (!%p366_p9)  ;;  %v421_v15 = vld [vmem:[%s4524_s1 + $0x40] sm:$0xff] (!%p366_p9)  ;;  %vm522_vm3 = vcmask (!%p366_p9), 258048   ;;  %vm3819_vm4 = vmmov (!%p366_p9), 0   ;;  %s3821_s27 = smov (!%p366_p9), 96  }
  0x12   : > { %3568 = vmatpush1.bf16.msra.mxu0 (!%p366_p9), %v3567_v4  ;;  %v3576_v14 = vpack.c.bf16 (!%p366_p9), %v420_v11, %v419_v10  ;;  %v422_v16 = vld [vmem:[%s4524_s1 + $0x48] sm:$0xff] (!%p366_p9)  ;;  %v423_v18 = vld [vmem:[%s4524_s1 + $0x50] sm:$0xff] (!%p366_p9)  ;;  %v424_v19 = vld [vmem:[%s4524_s1 + $0x58] sm:$0xff] (!%p366_p9)  ;;  %v3820_v8 = vmov (!%p366_p9), 0.0   ;;  %vm599_vm5 = vcmask (!%p366_p9), 261120   ;;  %s3822_s17 = smov (!%p366_p9), 88  }
  0x13   : > { %3569 = vmatprep.subr.bf16.mxu0 (!%p366_p9), %v3818_v3  ;;  %v3579_v17 = vpack.c.bf16 (!%p366_p9), %v422_v16, %v421_v15  ;;  %v3582_v20 = vpack.c.bf16 (!%p366_p9), %v424_v19, %v423_v18  ;;  %v425_v21 = vld [vmem:[%s4524_s1 + $0x60] sm:$0xff] (!%p366_p9)  ;;  %v426_v22 = vld [vmem:[%s4524_s1 + $0x68] sm:$0xff] (!%p366_p9)  ;;  %v427_v24 = vld [vmem:[%s4524_s1 + $0x70] sm:$0xff] (!%p366_p9)  ;;  %3372 = vmatprep.mubr.msk.f32.mxu1 (!%p366_p9), %vm3819_vm4, %v3820_v8  ;;  %vm676_vm6 = vcmask (!%p366_p9), 64512   ;;  %vm751_vm7 = vcmask (!%p366_p9), 36864   ;;  %s4544_s18 = smov (!%p366_p9), 64  }
  0x14   : > { %v3585_v23 = vpack.c.bf16 (!%p366_p9), %v426_v22, %v425_v21  ;;  %v428_v25 = vld [vmem:[%s4524_s1 + $0x78] sm:$0xff] (!%p366_p9)  ;;  %v429_v27 = vld [vmem:[%s4524_s1 + $0x80] sm:$0xff] (!%p366_p9)  ;;  %v430_v28 = vld [vmem:[%s4524_s1 + $0x88] sm:$0xff] (!%p366_p9)  ;;  %vm769_vm8 = vcmask (!%p366_p9), 1044480   ;;  %vm765_vm9 = vcmask (!%p366_p9), 39936   ;;  %s3825_s20 = smov (!%p366_p9), 56  }
  0x15   : > { %v3588_v26 = vpack.c.bf16 (!%p366_p9), %v428_v25, %v427_v24  ;;  %v3591_v29 = vpack.c.bf16 (!%p366_p9), %v430_v28, %v429_v27  ;;  %v431_v30 = vld [vmem:[%s4524_s1 + $0x90] sm:$0xff] (!%p366_p9)  ;;  %v432_v31 = vld [vmem:[%s4524_s1 + $0x98] sm:$0xff] (!%p366_p9)  ;;  %v433_v33 = vld [vmem:[%s4524_s1 + $0xa0] sm:$0xff] (!%p366_p9)  ;;  %s4543_s28 = smov (!%p366_p9), 80   ;;  %s4539_s23 = smov (!%p366_p9), 72   ;;  %vm3113_vm10 = vcmask (!%p366_p9), 258049  }
  0x16   : > { %3571 = vmatpush1.bf16.msra.mxu0 (!%p366_p9), %v3570_v6  ;;  %v3594_v32 = vpack.c.bf16 (!%p366_p9), %v432_v31, %v431_v30  ;;  %v434_v34 = vld [vmem:[%s4524_s1 + $0xa8] sm:$0xff] (!%p366_p9)  ;;  %v435_v36 = vld [vmem:[%s4524_s1 + $0xb0] sm:$0xff] (!%p366_p9)  ;;  %v436_v37 = vld [vmem:[%s4524_s1 + $0xb8] sm:$0xff] (!%p366_p9)  ;;  %s4541_s15 = smov (!%p366_p9), 104   ;;  %s4542_s30 = smov (!%p366_p9), 48  }
  0x17   : > { %s408_s29 = scalar_select %p407_p10, %s3919_s25, 1  ;;  %3572 = vmatprep.subr.bf16.mxu0 %v3818_v3  ;;  %v3597_v35 = vpack.c.bf16 %v434_v34, %v433_v33  ;;  %v3600_v38 = vpack.c.bf16 %v436_v37, %v435_v36  ;;  %v512_v39 = vld [vmem:[%s4525_s2] sm:$0x1]  ;;  %v3197_v57 = vld [vmem:[%s4527_s4 + $0x1] ss:$0 sm:$0xff]  ;;  %v549_v4 = vld [vmem:[%s4528_s5 + $0x8] sm:$0xff] }
  0x18   : > { %514 = vst.msk [vmem:[#allocation2] sm:$0x1] %vm513_vm1, %v512_v39  ;;  %v518_v42 = vld [vmem:[%s4526_s3] sm:$0x1f]  ;;  %v550_v5 = vld [vmem:[%s4528_s5 + $0x10] sm:$0xff]  ;;  %v551_v7 = vld [vmem:[%s4528_s5 + $0x18] sm:$0xff] }
  0x19   : > { %s3277_s19 = sshll.u32 %s408_s29, 3  ;;  %v3196_v55 = vld [vmem:[%s4527_s4] ss:$0 sm:$0xff]  ;;  %s4540_s29 = smov 40  }
  0x1a   : > { %s411_s26 = scalar_lea.vmem %s4523_s0, %s3277_s19  ;;  %3574 = vmatpush1.bf16.msra.mxu0 %v3573_v9  ;;  %v548_v2 = vld [vmem:[%s4528_s5] sm:$0xff]  ;;  %v3606_v9 = vpack.c.bf16 %v551_v7, %v550_v5  ;;  %s3824_s19 = smov 120  }
  0x1b   : > { %v412_v12 = vld [vmem:[%s411_s26] sm:$0xff]  ;;  %3575 = vmatprep.subr.bf16.mxu0 %v3818_v3  ;;  %v3603_v6 = vpack.c.bf16 %v549_v4, %v548_v2  ;;  %s4545_s26 = smov 112   ;;  %s404_s16 = sand.u32 1, %s3808_s22  }
  0x1c   : > { %v438_v13 = vcombine.high %v412_v12, %v412_v12  ;;  %v4082_v16 = vld [vmem:[%s4532_s9] sm:$0x3f] }
  0x1d   : > { %3604 = vmatpush3.bf16.msra.mxu1 %v3603_v6  ;;  %v3198_v24 = vld [vmem:[%s4533_s10] ss:$0 sm:$0xff] }
  0x1e   : > { %3195 = vmatprep.mubr.msk.f32.mxu0 %vm439_vm0, %v438_v13  ;;  %3577 = vmatpush1.bf16.msra.mxu0 %v3576_v14 }
  0x1f   : > { %3578 = vmatprep.subr.bf16.mxu0 %v3818_v3  ;;  %3605 = vmatprep.subr.bf16.mxu1 %v3818_v3 }
  0x21   : > { %3607 = vmatpush3.bf16.msra.mxu1 %v3606_v9 }
  0x22   : > { %3580 = vmatpush1.bf16.msra.mxu0 %v3579_v17  ;;  %3380 = vmatprep.subr.mxu1 %v3820_v8 }
  0x23   : > { %3581 = vmatprep.subr.bf16.mxu0 %v3818_v3 }
  0x26   : > { %3583 = vmatpush1.bf16.msra.mxu0 %v3582_v20 }
  0x27   : > { %3584 = vmatprep.subr.bf16.mxu0 %v3818_v3 }
  0x2a   : > { %3586 = vmatpush1.bf16.msra.mxu0 %v3585_v23 }
  0x2b   : > { %3587 = vmatprep.subr.bf16.mxu0 %v3818_v3 }
  0x2e   : > { %3589 = vmatpush1.bf16.msra.mxu0 %v3588_v26 }
  0x2f   : > { %3590 = vmatprep.subr.bf16.mxu0 %v3818_v3 }
  0x32   : > { %3592 = vmatpush1.bf16.msra.mxu0 %v3591_v29 }
  0x33   : > { %3593 = vmatprep.subr.bf16.mxu0 %v3818_v3 }
  0x36   : > { %3595 = vmatpush1.bf16.msra.mxu0 %v3594_v32 }
  0x37   : > { %3596 = vmatprep.subr.bf16.mxu0 %v3818_v3 }
  0x3a   : > { %3598 = vmatpush1.bf16.msra.mxu0 %v3597_v35 }
  0x3b   : > { %3599 = vmatprep.subr.bf16.mxu0 %v3818_v3 }
  0x3e   : > { %3601 = vmatpush1.bf16.msra.mxu0 %v3600_v38 }
  0x3f   : > { %3375 = vmatprep.subr.mxu0 %v3820_v8 }
  0x41   : > { %507 = vmatmul.mubr.f32.vlgmr.msra.gmra.mrb[0].mxu0 %v412_v12  ;;  %v583_v12 = vlaneseq }
  0x42   : > { %3377 = vmatprep.mubr.msk.f32.mxu0 %vm3819_vm4, %v3820_v8 }
  0x43   : > { %v4076_v14 = vshrl.u32 %v583_v12, 7 }
  0x45   : > { %v585_v15 = vsub.s32 0, %v4076_v14  ;;  %v590_v17 = vsub.s32 1, %v4076_v14 }
  0x47   : > { %v586_v18 = vrot.slane %v4082_v16, %v585_v15  ;;  %v591_v21 = vrot.slane %v4082_v16, %v590_v17 }
 0x114   : > { %v508_v40 = vpop.f32.mrb[0].mxu0 }
 0x115   : > { %516 = vst.msk [vmem:[#allocation2 + $0x1] sm:$0xf] %vm515_vm2, %v508_v40  ;;  %v510_v41 = vpop.f32.mrb[1].mxu0 }
 0x11c   : > { %v517_v43 = vld [vmem:[#allocation2] sm:$0x1f] }
 0x11d   : > { %v519_v44 = vadd.f32 %v518_v42, %v517_v43 }
 0x11f   : > { %v523_v45 = vsel %vm522_vm3, %v519_v44, 0.0 }
 0x120   : > { %524 = vadd.xlane.f32.xlu0 %v523_v45 }
 0x1ad   : > { %v525_v46 = vpop.xlane.xlu0 %524 }
 0x1ae   : > { %v527_v47 = vmul.f32 0.03125, %v525_v46 }
 0x1b0   : > { %v528_v48 = vsub.f32 %v519_v44, %v527_v47 }
 0x1b2   : > { %v529_v49 = vmul.f32 %v528_v48, %v528_v48 }
 0x1b4   : > { %v530_v50 = vsel %vm522_vm3, %v529_v49, 0.0 }
 0x1b5   : > { %531 = vadd.xlane.f32.xlu0 %v530_v50 }
 0x242   : > { %v532_v51 = vpop.xlane.xlu0 %531 }
 0x243   : > { %v533_v52 = vmul.f32 0.03125, %v532_v51 }
 0x245   : > { %v534_v53 = vadd.f32 1e-05, %v533_v52 }
 0x247   : > { %3704 = vrsqrt.f32 %v534_v53 }
 0x251   : > { %v3705_v54 = vpop.eup %3704 }
 0x252   : > { %v536_v56 = vmul.f32 %v3705_v54, %v528_v48 }
 0x254   : > { %v541_v58 = vmul.f32 %v3196_v55, %v536_v56 }
 0x256   : > { %v4051_v59 = vadd.f32 %v3197_v57, %v541_v58  ;;  %v554_v57 = vld [vmem:[%s4529_s6 + $0x8] sm:$0xff]  ;;  %v553_v58 = vld [vmem:[%s4529_s6] sm:$0xff] }
 0x258   : > { %v570_v60 = vsel %vm522_vm3, %v4051_v59, 0.0 }
 0x259   : > { %571 = vadd.xlane.f32.xlu1 %v570_v60 }
 0x2e6   : > { %v572_v61 = vpop.xlane.xlu1 %571 }
 0x2e7   : > { %v573_v62 = vmul.f32 0.03125, %v572_v61 }
 0x2e9   : > { %v574_v63 = vsub.f32 %v4051_v59, %v573_v62 }
 0x2eb   : > { %v575_v0 = vmul.f32 %v574_v63, %v574_v63 }
 0x2ed   : > { %v576_v1 = vsel %vm522_vm3, %v575_v0, 0.0 }
 0x2ee   : > { %577 = vadd.xlane.f32.xlu1 %v576_v1 }
 0x37b   : > { %v578_v10 = vpop.xlane.xlu1 %577 }
 0x37c   : > { %v579_v11 = vmul.f32 0.03125, %v578_v10 }
 0x37e   : > { %v580_v13 = vadd.f32 1e-05, %v579_v11 }
 0x380   : > { %3706 = vrsqrt.f32 %v580_v13 }
 0x38a   : > { %v3707_v19 = vpop.eup %3706 }
 0x38b   : > { %v582_v20 = vmul.f32 %v3707_v19, %v574_v63 }
 0x38d   : > { %v587_v22 = vmul.f32 %v586_v18, %v582_v20 }
 0x38f   : > { %v592_v23 = vadd.f32 %v591_v21, %v587_v22 }
 0x391   : > { %3373 = vmatmul.mubr.msk.f32.vlgmr.msra.gmra.mrb[0].mxu1 %vm599_vm5, %v592_v23  ;;  %v555_v23 = vld [vmem:[%s4529_s6 + $0x10] sm:$0xff] }
 0x392   : > { %3382 = vmatprep.mubr.msk.f32.mxu1 %vm3819_vm4, %v3820_v8 }
 0x464   : > { %v669_v25 = vpop.f32.mrb[0].mxu1 }
 0x465   : > { %v4097_v26 = vadd.f32 %v3198_v24, %v669_v25  ;;  %v3374_v27 = vpop.f32.mrb[1].mxu1 }
 0x467   : > { %674 = vrot.lane.b32.xlu0 %v4097_v26, %s3821_s27 }
 0x46b   : > { %844 = vrot.lane.b32.xlu0 %v4097_v26, %s3822_s17 }
 0x4d9   : > { %v675_v28 = vpop.permute.xlu0 %674 }
 0x4da   : > { %3376 = vmatpush3.xpose.msk.msra.mxu0 %vm676_vm6, %v675_v28 }
 0x4db   : > { %3425 = vmatprep.subr.mxu0 %v3820_v8 }
 0x4dd   : > { %3378 = vmatmul.mubr.msk.f32.vlgmr.msra.gmra.mrb[2].mxu0 %vm676_vm6, %v4097_v26  ;;  %v845_v41 = vpop.permute.xlu0 %844 }
 0x4de   : > { %3427 = vmatprep.mubr.msk.f32.mxu0 %vm3819_vm4, %v3820_v8 }
 0x5b0   : > { %v747_v29 = vpop.f32.mrb[2].mxu0 }
 0x5b1   : > { %v3379_v30 = vpop.f32.mrb[3].mxu0  ;;  %v752_v31 = vsel %vm751_vm7, %v747_v29, -inf }
 0x5b2   : > { %753 = vmax.xlane.f32.xlu1 %v752_v31 }
 0x5c3   : > { %763 = vrot.lane.b32.xlu1 %v4097_v26, %s4544_s18  ;;  %s3192_s18 = sshll.u32 %s404_s16, 2 }
 0x63f   : > { %v754_v32 = vpop.xlane.xlu1 %753 }
 0x640   : > { %v755_v33 = vsub.f32 %v747_v29, %v754_v32 }
 0x642   : > { %v756_v34 = vmul.f32 1.442695, %v755_v33 }
 0x643   : > { %v764_v35 = vpop.permute.xlu1 %763 }
 0x644   : > { %3708 = vpow2.f32 %v756_v34  ;;  %3381 = vmatpush3.msk.msra.mxu1 %vm769_vm8, %v764_v35 }
 0x645   : > { %3385 = vmatprep.subr.mxu1 %v3820_v8 }
 0x64e   : > { %v3709_v36 = vpop.eup %3708 }
 0x64f   : > { %v758_v37 = vsel %vm751_vm7, %v3709_v36, 0.0 }
 0x650   : > { %759 = vadd.xlane.f32.xlu1 %v758_v37 }
 0x661   : > { %842 = vrot.lane.b32.xlu1 %v4097_v26, %s3824_s19 }
 0x6dd   : > { %v760_v38 = vpop.xlane.xlu1 %759 }
 0x6de   : > { %3710 = vrcp.f32 %v760_v38 }
 0x6e1   : > { %v843_v42 = vpop.permute.xlu1 %842 }
 0x6e8   : > { %v3711_v39 = vpop.eup %3710 }
 0x6e9   : > { %v762_v40 = vmul.f32 %v3711_v39, %v3709_v36 }
 0x6eb   : > { %3383 = vmatmul.mubr.msk.f32.vlgmr.msra.gmra.mrb[2].mxu1 %vm765_vm9, %v762_v40 }
 0x6ec   : > { %3386 = vmatpush3.xpose.msk.msra.mxu1 %vm676_vm6, %v845_v41  ;;  %3387 = vmatprep.mubr.msk.f32.mxu1 %vm3819_vm4, %v3820_v8  ;;  %v556_v41 = vld [vmem:[%s4529_s6 + $0x18] sm:$0xff] }
 0x6ed   : > { %3390 = vmatprep.subr.mxu1 %v3820_v8 }
 0x6ef   : > { %3388 = vmatmul.mubr.msk.f32.vlgmr.msra.gmra.mrb[4].mxu1 %vm676_vm6, %v843_v42 }
 0x6f0   : > { %3392 = vmatprep.mubr.msk.f32.mxu1 %vm3819_vm4, %v3820_v8 }
 0x7be   : > { %v838_v43 = vpop.f32.mrb[2].mxu1 }
 0x7bf   : > { %v3384_v44 = vpop.f32.mrb[3].mxu1 }
 0x7c2   : > { %v916_v45 = vpop.f32.mrb[4].mxu1 }
 0x7c3   : > { %v3389_v46 = vpop.f32.mrb[5].mxu1  ;;  %v920_v47 = vsel %vm751_vm7, %v916_v45, -inf }
 0x7c4   : > { %921 = vmax.xlane.f32.xlu0 %v920_v47  ;;  %v1637_v46 = vsub.s32 4, %v4076_v14 }
 0x7da   : > { %931 = vrot.lane.b32.xlu0 %v4097_v26, %s3825_s20 }
 0x7de   : > { %1154 = vrot.lane.b32.xlu0 %v4097_v26, %s4545_s26  ;;  %s4554_s26 = smov 48  }
 0x851   : > { %v922_v48 = vpop.xlane.xlu0 %921 }
 0x852   : > { %v923_v49 = vsub.f32 %v916_v45, %v922_v48 }
 0x854   : > { %v924_v50 = vmul.f32 1.442695, %v923_v49  ;;  %v1638_v49 = vrot.slane %v4082_v16, %v1637_v46 }
 0x855   : > { %v932_v51 = vpop.permute.xlu0 %931 }
 0x856   : > { %3712 = vpow2.f32 %v924_v50  ;;  %3391 = vmatpush3.msk.msra.mxu1 %vm769_vm8, %v932_v51 }
 0x857   : > { %3395 = vmatprep.subr.mxu1 %v3820_v8 }
 0x859   : > { %v1155_v63 = vpop.permute.xlu0 %1154 }
 0x860   : > { %v3713_v52 = vpop.eup %3712 }
 0x861   : > { %v926_v53 = vsel %vm751_vm7, %v3713_v52, 0.0 }
 0x862   : > { %927 = vadd.xlane.f32.xlu1 %v926_v53 }
 0x873   : > { %1156 = vrot.lane.b32.xlu1 %v4097_v26, %s4543_s28  ;;  %s4555_s28 = smov 104  }
 0x8ef   : > { %v928_v54 = vpop.xlane.xlu1 %927 }
 0x8f0   : > { %3714 = vrcp.f32 %v928_v54 }
 0x8f3   : > { %v1157_v62 = vpop.permute.xlu1 %1156 }
 0x8fa   : > { %v3715_v55 = vpop.eup %3714 }
 0x8fb   : > { %v930_v56 = vmul.f32 %v3715_v55, %v3713_v52 }
 0x8fd   : > { %3393 = vmatmul.mubr.msk.f32.vlgmr.msra.gmra.mrb[6].mxu1 %vm765_vm9, %v930_v56 }
 0x8fe   : > { %3396 = vmatpush3.msra.mxu1 %v554_v57  ;;  %3397 = vmatprep.mubr.msk.f32.mxu1 %vm3819_vm4, %v3820_v8 }
 0x8ff   : > { %3400 = vmatprep.subr.mxu1 %v3820_v8 }
 0x9d0   : > { %v1004_v60 = vpop.f32.mrb[6].mxu1 }
 0x9d1   : > { %v3394_v61 = vpop.f32.mrb[7].mxu1  ;;  %3398 = vmatmul.mubr.msk.f32.vlgmr.msra.gmra.mrb[8].mxu1 %vm676_vm6, %v1004_v60  ;;  %v557_v60 = vld [vmem:[%s4530_s7] sm:$0xff] }
 0x9d2   : > { %3401 = vmatpush3.msra.mxu1 %v553_v58  ;;  %3402 = vmatprep.mubr.msk.f32.mxu1 %vm3819_vm4, %v3820_v8 }
 0x9d3   : > { %3405 = vmatprep.subr.mxu1 %v3820_v8 }
 0x9d5   : > { %3403 = vmatmul.mubr.msk.f32.vlgmr.msra.gmra.mrb[10].mxu1 %vm676_vm6, %v838_v43 }
 0x9d6   : > { %3407 = vmatprep.mubr.msk.f32.mxu1 %vm3819_vm4, %v3820_v8 }
 0x9d9   : > { %3406 = vmatpush3.xpose.msk.msra.mxu1 %vm676_vm6, %v1157_v62  ;;  %v559_v62 = vld [vmem:[%s4530_s7 + $0x10] sm:$0xff] }
 0x9da   : > { %3410 = vmatprep.subr.mxu1 %v3820_v8 }
 0x9dc   : > { %3408 = vmatmul.mubr.msk.f32.vlgmr.msra.gmra.mrb[12].mxu1 %vm676_vm6, %v1155_v63  ;;  %v560_v63 = vld [vmem:[%s4530_s7 + $0x18] sm:$0xff] }
 0x9dd   : > { %3412 = vmatprep.mubr.msk.f32.mxu1 %vm3819_vm4, %v3820_v8 }
 0xaa4   : > { %v1077_v0 = vpop.f32.mrb[8].mxu1 }
 0xaa5   : > { %v3399_v1 = vpop.f32.mrb[9].mxu1 }
 0xaa8   : > { %v1150_v2 = vpop.f32.mrb[10].mxu1 }
 0xaa9   : > { %v1151_v4 = vadd.f32 %v1150_v2, %v1077_v0  ;;  %v3404_v5 = vpop.f32.mrb[11].mxu1  ;;  %v3612_v0 = vpack.c.bf16 %v560_v63, %v559_v62 }
 0xaaa   : > { %v1655_v5 = vsub.s32 2, %v4076_v14 }
 0xaaf   : > { %v1228_v6 = vpop.f32.mrb[12].mxu1 }
 0xab0   : > { %v3409_v7 = vpop.f32.mrb[13].mxu1  ;;  %v1232_v9 = vsel %vm751_vm7, %v1228_v6, -inf }
 0xab1   : > { %1233 = vmax.xlane.f32.xlu1 %v1232_v9  ;;  %v1656_v7 = vrot.slane %v4082_v16, %v1655_v5 }
 0xac2   : > { %1396 = vrot.lane.b32.xlu1 %v4097_v26, %s4539_s23 }
 0xac6   : > { %1394 = vrot.lane.b32.xlu1 %v4097_v26, %s4541_s15  ;;  %s4556_s15 = smov 72  }
 0xb3e   : > { %v1234_v10 = vpop.xlane.xlu1 %1233 }
 0xb3f   : > { %v1235_v11 = vsub.f32 %v1228_v6, %v1234_v10  ;;  %v1660_v6 = vsub.s32 3, %v4076_v14 }
 0xb41   : > { %v1236_v12 = vmul.f32 1.442695, %v1235_v11  ;;  %v1661_v11 = vrot.slane %v4082_v16, %v1660_v6 }
 0xb42   : > { %v1397_v24 = vpop.permute.xlu1 %1396 }
 0xb43   : > { %3716 = vpow2.f32 %v1236_v12 }
 0xb46   : > { %v1395_v28 = vpop.permute.xlu1 %1394 }
 0xb4d   : > { %v3717_v13 = vpop.eup %3716 }
 0xb4e   : > { %v1238_v18 = vsel %vm751_vm7, %v3717_v13, 0.0 }
 0xb4f   : > { %1239 = vadd.xlane.f32.xlu0 %v1238_v18  ;;  %v562_v18 = vld [vmem:[%s4531_s8] sm:$0xff] }
 0xb65   : > { %1243 = vrot.lane.b32.xlu0 %v4097_v26, %s4542_s30 }
 0xbdc   : > { %v1240_v19 = vpop.xlane.xlu0 %1239 }
 0xbdd   : > { %3718 = vrcp.f32 %v1240_v19  ;;  %v563_v19 = vld [vmem:[%s4531_s8 + $0x8] sm:$0xff] }
 0xbe0   : > { %v1244_v20 = vpop.permute.xlu0 %1243 }
 0xbe1   : > { %3411 = vmatpush3.msk.msra.mxu1 %vm769_vm8, %v1244_v20  ;;  %v3615_v20 = vpack.c.bf16 %v563_v19, %v562_v18 }
 0xbe2   : > { %3415 = vmatprep.subr.mxu1 %v3820_v8 }
 0xbe7   : > { %v3719_v21 = vpop.eup %3718 }
 0xbe8   : > { %v1242_v22 = vmul.f32 %v3719_v21, %v3717_v13  ;;  %v564_v21 = vld [vmem:[%s4531_s8 + $0x10] sm:$0xff] }
 0xbea   : > { %3413 = vmatmul.mubr.msk.f32.vlgmr.msra.gmra.mrb[14].mxu1 %vm765_vm9, %v1242_v22  ;;  %v565_v22 = vld [vmem:[%s4531_s8 + $0x18] sm:$0xff] }
 0xbeb   : > { %3416 = vmatpush3.msra.mxu1 %v555_v23  ;;  %3417 = vmatprep.mubr.msk.f32.mxu1 %vm3819_vm4, %v3820_v8  ;;  %v3618_v23 = vpack.c.bf16 %v565_v22, %v564_v21 }
 0xbec   : > { %3420 = vmatprep.subr.mxu1 %v3820_v8 }
 0xcbd   : > { %v1316_v25 = vpop.f32.mrb[14].mxu1 }
 0xcbe   : > { %v3414_v27 = vpop.f32.mrb[15].mxu1  ;;  %3418 = vmatmul.mubr.msk.f32.vlgmr.msra.gmra.mrb[16].mxu1 %vm676_vm6, %v1316_v25  ;;  %v567_v25 = vld [vmem:[%s4531_s8 + $0x28] sm:$0xff] }
 0xcbf   : > { %3421 = vmatpush3.xpose.msk.msra.mxu1 %vm676_vm6, %v1397_v24  ;;  %3422 = vmatprep.mubr.msk.f32.mxu1 %vm3819_vm4, %v3820_v8  ;;  %v566_v24 = vld [vmem:[%s4531_s8 + $0x20] sm:$0xff] }
 0xcc0   : > { %3430 = vmatprep.subr.mxu1 %v3820_v8  ;;  %v3621_v27 = vpack.c.bf16 %v567_v25, %v566_v24 }
 0xcc2   : > { %3423 = vmatmul.mubr.msk.f32.vlgmr.msra.gmra.mrb[18].mxu1 %vm676_vm6, %v1395_v28  ;;  %v568_v28 = vld [vmem:[%s4531_s8 + $0x30] sm:$0xff] }
 0xcc3   : > { %3432 = vmatprep.mubr.msk.f32.mxu1 %vm3819_vm4, %v3820_v8  ;;  %3431 = vmatpush3.msra.mxu1 %v556_v41  ;;  %v1826_v41 = vsub.s32 5, %v4076_v14 }
 0xcc4   : > { %3614 = vmatprep.subr.bf16.mxu1 %v3818_v3 }
 0xd91   : > { %v1389_v29 = vpop.f32.mrb[16].mxu1 }
 0xd92   : > { %v1393_v30 = vadd.f32 %v1389_v29, %v1151_v4  ;;  %v3419_v31 = vpop.f32.mrb[17].mxu1  ;;  %v569_v29 = vld [vmem:[%s4531_s8 + $0x38] sm:$0xff] }
 0xd93   : > { %v3220_v31 = vld [vmem:[%s4534_s11] ss:$0 sm:$0xff] }
 0xd95   : > { %v1468_v32 = vpop.f32.mrb[18].mxu1 }
 0xd96   : > { %v3424_v33 = vpop.f32.mrb[19].mxu1  ;;  %v1472_v34 = vsel %vm751_vm7, %v1468_v32, -inf }
 0xd97   : > { %1473 = vmax.xlane.f32.xlu0 %v1472_v34 }
 0xdad   : > { %1483 = vrot.lane.b32.xlu0 %v4097_v26, %s4540_s29 }
 0xe24   : > { %v1474_v35 = vpop.xlane.xlu0 %1473 }
 0xe25   : > { %v1475_v36 = vsub.f32 %v1468_v32, %v1474_v35 }
 0xe27   : > { %v1476_v37 = vmul.f32 1.442695, %v1475_v36 }
 0xe28   : > { %v1484_v38 = vpop.permute.xlu0 %1483 }
 0xe29   : > { %3720 = vpow2.f32 %v1476_v37  ;;  %3426 = vmatpush3.msk.msra.mxu0 %vm769_vm8, %v1484_v38 }
 0xe2a   : > { %3608 = vmatprep.subr.bf16.mxu0 %v3818_v3 }
 0xe33   : > { %v3721_v39 = vpop.eup %3720 }
 0xe34   : > { %v1478_v40 = vsel %vm751_vm7, %v3721_v39, 0.0 }
 0xe35   : > { %1479 = vadd.xlane.f32.xlu1 %v1478_v40 }
 0xec2   : > { %v1480_v26 = vpop.xlane.xlu1 %1479 }
 0xec3   : > { %3722 = vrcp.f32 %v1480_v26  ;;  %v1827_v26 = vrot.slane %v4082_v16, %v1826_v41  ;;  %v3225_v16 = vld [vmem:[%s4528_s5 + $0x20] sm:$0xff] }
 0xecd   : > { %v3723_v42 = vpop.eup %3722 }
 0xece   : > { %v1482_v43 = vmul.f32 %v3723_v42, %v3721_v39 }
 0xed0   : > { %3428 = vmatmul.mubr.msk.f32.vlgmr.msra.gmra.mrb[4].mxu0 %vm765_vm9, %v1482_v43 }
 0xed1   : > { %3443 = vmatprep.mubr.msk.f32.mxu0 %vm3819_vm4, %v3820_v8 }
 0xfa3   : > { %v1556_v44 = vpop.f32.mrb[4].mxu0 }
 0xfa4   : > { %v3429_v45 = vpop.f32.mrb[5].mxu0  ;;  %3433 = vmatmul.mubr.msk.f32.vlgmr.msra.gmra.mrb[20].mxu1 %vm676_vm6, %v1556_v44 }
 0xfa5   : > { %3462 = vmatprep.mubr.msk.f32.mxu1 %vm3819_vm4, %v3820_v8  ;;  %3616 = vmatpush3.bf16.msra.mxu1 %v3615_v20 }
 0xfa6   : > { %3617 = vmatprep.subr.bf16.mxu1 %v3818_v3 }
 0xfa9   : > { %3619 = vmatpush3.bf16.msra.mxu1 %v3618_v23 }
 0xfaa   : > { %3620 = vmatprep.subr.bf16.mxu1 %v3818_v3 }
 0xfad   : > { %3622 = vmatpush3.bf16.msra.mxu1 %v3621_v27 }
 0xfae   : > { %3623 = vmatprep.subr.bf16.mxu1 %v3818_v3 }
0x1077   : > { %v1629_v47 = vpop.f32.mrb[20].mxu1 }
0x1078   : > { %v1633_v48 = vadd.f32 %v1629_v47, %v1393_v30  ;;  %v3434_v50 = vpop.f32.mrb[21].mxu1  ;;  %v3624_v30 = vpack.c.bf16 %v569_v29, %v568_v28 }
0x107a   : > { %v1634_v51 = vadd.f32 %v1633_v48, %v4051_v59  ;;  %v558_v59 = vld [vmem:[%s4530_s7 + $0x8] sm:$0xff]  ;;  %3625 = vmatpush3.bf16.msra.mxu1 %v3624_v30 }
0x107b   : > { %v3609_v61 = vpack.c.bf16 %v558_v59, %v557_v60  ;;  %3481 = vmatprep.subr.mxu1 %v3820_v8 }
0x107c   : > { %v4203_v52 = vadd.f32 %v1638_v49, %v1634_v51 }
0x107d   : > { %3610 = vmatpush3.bf16.msra.mxu0 %v3609_v61  ;;  %v4296_v61 = vld [vmem:[%s4532_s9 + $0x8] sm:$0x3f] }
0x107e   : > { %v1640_v53 = vsel %vm522_vm3, %v4203_v52, 0.0  ;;  %3611 = vmatprep.subr.bf16.mxu0 %v3818_v3  ;;  %v1875_v62 = vrot.slane %v4296_v61, %v585_v15 }
0x107f   : > { %1641 = vadd.xlane.f32.xlu1 %v1640_v53 }
0x1081   : > { %3613 = vmatpush3.bf16.msra.mxu0 %v3612_v0  ;;  %v1880_v0 = vrot.slane %v4296_v61, %v590_v17 }
0x1082   : > { %3626 = vmatprep.subr.bf16.mxu0 %v3818_v3 }
0x110c   : > { %v1642_v54 = vpop.xlane.xlu1 %1641 }
0x110d   : > { %v1643_v55 = vmul.f32 0.03125, %v1642_v54 }
0x110f   : > { %v1644_v56 = vsub.f32 %v4203_v52, %v1643_v55  ;;  %v3227_v55 = vld [vmem:[%s4528_s5 + $0x30] sm:$0xff] }
0x1111   : > { %v1645_v57 = vmul.f32 %v1644_v56, %v1644_v56 }
0x1113   : > { %v1646_v58 = vsel %vm522_vm3, %v1645_v57, 0.0 }
0x1114   : > { %1647 = vadd.xlane.f32.xlu1 %v1646_v58 }
0x11a1   : > { %v1648_v1 = vpop.xlane.xlu1 %1647 }
0x11a2   : > { %v1649_v2 = vmul.f32 0.03125, %v1648_v1 }
0x11a4   : > { %v1650_v4 = vadd.f32 1e-05, %v1649_v2 }
0x11a6   : > { %3724 = vrsqrt.f32 %v1650_v4 }
0x11b0   : > { %v3725_v9 = vpop.eup %3724 }
0x11b1   : > { %v1652_v10 = vmul.f32 %v3725_v9, %v1644_v56  ;;  %v3228_v56 = vld [vmem:[%s4528_s5 + $0x38] sm:$0xff] }
0x11b2   : > { %v3630_v57 = vpack.c.bf16 %v3228_v56, %v3227_v55 }
0x11b3   : > { %v1657_v12 = vmul.f32 %v1656_v7, %v1652_v10  ;;  %v3247_v7 = vld [vmem:[%s4533_s10 + $0x1] ss:$0 sm:$0xff] }
0x11b5   : > { %v1662_v13 = vadd.f32 %v1661_v11, %v1657_v12 }
0x11b7   : > { %3444 = vmatmul.mubr.msk.f32.vlgmr.msra.gmra.mrb[6].mxu0 %vm599_vm5, %v1662_v13 }
0x11b8   : > { %3473 = vmatprep.mubr.msk.f32.mxu0 %vm3819_vm4, %v3820_v8 }
0x128a   : > { %v1738_v32 = vpop.f32.mrb[6].mxu0 }
0x128b   : > { %v1739_v33 = vadd.f32 %v3220_v31, %v1738_v32  ;;  %v3445_v34 = vpop.f32.mrb[7].mxu0 }
0x128c   : > { %v3231_v34 = vld [vmem:[%s4529_s6 + $0x28] sm:$0xff] }
0x128d   : > { %v3222_v35 = vmul.f32 -1.702, %v1739_v33 }
0x128f   : > { %v1744_v36 = vmul.f32 1.442695, %v3222_v35 }
0x1291   : > { %3726 = vpow2.f32 %v1744_v36 }
0x129b   : > { %v3727_v37 = vpop.eup %3726 }
0x129c   : > { %v1746_v38 = vadd.f32 1.0, %v3727_v37 }
0x129e   : > { %3728 = vrcp.f32 %v1746_v38 }
0x12a8   : > { %v3729_v39 = vpop.eup %3728 }
0x12a9   : > { %v1749_v40 = vmul.f32 %v3729_v39, %v1739_v33 }
0x12ab   : > { %3463 = vmatmul.mubr.msk.f32.vlgmr.msra.gmra.mrb[22].mxu1 %vm439_vm0, %v1749_v40 }
0x12ac   : > { %3483 = vmatprep.mubr.msk.f32.mxu1 %vm3819_vm4, %v3820_v8 }
0x137e   : > { %v1819_v42 = vpop.f32.mrb[22].mxu1 }
0x137f   : > { %v1823_v43 = vadd.f32 %v1819_v42, %v4203_v52  ;;  %v3464_v44 = vpop.f32.mrb[23].mxu1  ;;  %v3226_v52 = vld [vmem:[%s4528_s5 + $0x28] sm:$0xff] }
0x1380   : > { %v3627_v54 = vpack.c.bf16 %v3226_v52, %v3225_v16 }
0x1381   : > { %v4273_v45 = vadd.f32 %v1827_v26, %v1823_v43  ;;  %v3230_v43 = vld [vmem:[%s4529_s6 + $0x20] sm:$0xff] }
0x1382   : > { %3628 = vmatpush3.bf16.msra.mxu0 %v3627_v54 }
0x1383   : > { %v1859_v47 = vsel %vm522_vm3, %v4273_v45, 0.0  ;;  %3629 = vmatprep.subr.bf16.mxu0 %v3818_v3 }
0x1384   : > { %1860 = vadd.xlane.f32.xlu1 %v1859_v47 }
0x1386   : > { %3631 = vmatpush3.bf16.msra.mxu0 %v3630_v57 }
0x1387   : > { %3476 = vmatprep.subr.mxu0 %v3820_v8 }
0x1411   : > { %v1861_v48 = vpop.xlane.xlu1 %1860 }
0x1412   : > { %v1862_v49 = vmul.f32 0.03125, %v1861_v48 }
0x1414   : > { %v1863_v50 = vsub.f32 %v4273_v45, %v1862_v49 }
0x1416   : > { %v1864_v51 = vmul.f32 %v1863_v50, %v1863_v50 }
0x1418   : > { %v1865_v53 = vsel %vm522_vm3, %v1864_v51, 0.0 }
0x1419   : > { %1866 = vadd.xlane.f32.xlu1 %v1865_v53 }
0x14a6   : > { %v1867_v58 = vpop.xlane.xlu1 %1866 }
0x14a7   : > { %v1868_v60 = vmul.f32 0.03125, %v1867_v58 }
0x14a9   : > { %v1869_v59 = vadd.f32 1e-05, %v1868_v60 }
0x14ab   : > { %3730 = vrsqrt.f32 %v1869_v59 }
0x14b5   : > { %v3731_v63 = vpop.eup %3730 }
0x14b6   : > { %v1871_v1 = vmul.f32 %v3731_v63, %v1863_v50 }
0x14b8   : > { %v1876_v2 = vmul.f32 %v1875_v62, %v1871_v1 }
0x14ba   : > { %v1881_v4 = vadd.f32 %v1880_v0, %v1876_v2 }
0x14bc   : > { %3474 = vmatmul.mubr.msk.f32.vlgmr.msra.gmra.mrb[8].mxu0 %vm599_vm5, %v1881_v4 }
0x14bd   : > { %3478 = vmatprep.mubr.msk.f32.mxu0 %vm3819_vm4, %v3820_v8 }
0x158f   : > { %v1957_v9 = vpop.f32.mrb[8].mxu0 }
0x1590   : > { %v4310_v10 = vadd.f32 %v3247_v7, %v1957_v9  ;;  %v3475_v15 = vpop.f32.mrb[9].mxu0 }
0x1592   : > { %2128 = vrot.lane.b32.xlu1 %v4310_v10, %s3822_s17  ;;  %1962 = vrot.lane.b32.xlu0 %v4310_v10, %s3821_s27  ;;  %s4551_s27 = smov 112   ;;  %s4552_s17 = smov 64  }
0x1596   : > { %2126 = vrot.lane.b32.xlu0 %v4310_v10, %s3824_s19  ;;  %s4553_s19 = smov 80  }
0x1604   : > { %v1963_v17 = vpop.permute.xlu0 %1962  ;;  %v2129_v11 = vpop.permute.xlu1 %2128 }
0x1605   : > { %3477 = vmatpush3.xpose.msk.msra.mxu0 %vm676_vm6, %v1963_v17  ;;  %v3232_v17 = vld [vmem:[%s4529_s6 + $0x30] sm:$0xff] }
0x1606   : > { %3486 = vmatprep.subr.mxu0 %v3820_v8 }
0x1608   : > { %3479 = vmatmul.mubr.msk.f32.vlgmr.msra.gmra.mrb[10].mxu0 %vm676_vm6, %v4310_v10  ;;  %v2127_v12 = vpop.permute.xlu0 %2126 }
0x1609   : > { %3487 = vmatpush3.xpose.msk.msra.mxu0 %vm676_vm6, %v2129_v11  ;;  %3488 = vmatprep.mubr.msk.f32.mxu0 %vm3819_vm4, %v3820_v8 }
0x160a   : > { %3496 = vmatprep.subr.mxu0 %v3820_v8 }
0x160c   : > { %3489 = vmatmul.mubr.msk.f32.vlgmr.msra.gmra.mrb[12].mxu0 %vm676_vm6, %v2127_v12 }
0x160d   : > { %3498 = vmatprep.mubr.msk.f32.mxu0 %vm3819_vm4, %v3820_v8  ;;  %3497 = vmatpush3.msra.mxu0 %v3231_v34 }
0x160e   : > { %3506 = vmatprep.subr.mxu0 %v3820_v8 }
0x16db   : > { %v2034_v13 = vpop.f32.mrb[10].mxu0 }
0x16dc   : > { %v3480_v18 = vpop.f32.mrb[11].mxu0  ;;  %v2038_v19 = vsel %vm751_vm7, %v2034_v13, -inf }
0x16dd   : > { %2039 = vmax.xlane.f32.xlu0 %v2038_v19 }
0x16df   : > { %v2200_v20 = vpop.f32.mrb[12].mxu0 }
0x16e0   : > { %v3490_v21 = vpop.f32.mrb[13].mxu0  ;;  %v2204_v22 = vsel %vm751_vm7, %v2200_v20, -inf }
0x16e1   : > { %2205 = vmax.xlane.f32.xlu1 %v2204_v22 }
0x16f2   : > { %2215 = vrot.lane.b32.xlu1 %v4310_v10, %s3825_s20 }
0x16f6   : > { %2438 = vrot.lane.b32.xlu1 %v4310_v10, %s4551_s27  ;;  %s4557_s27 = smov 40  }
0x176a   : > { %v2040_v23 = vpop.xlane.xlu0 %2039 }
0x176b   : > { %v2041_v24 = vsub.f32 %v2034_v13, %v2040_v23 }
0x176d   : > { %v2042_v25 = vmul.f32 1.442695, %v2041_v24 }
0x176e   : > { %v2206_v27 = vpop.xlane.xlu1 %2205 }
0x176f   : > { %3732 = vpow2.f32 %v2042_v25  ;;  %v2207_v28 = vsub.f32 %v2200_v20, %v2206_v27  ;;  %v3233_v25 = vld [vmem:[%s4529_s6 + $0x38] sm:$0xff] }
0x1771   : > { %v2208_v29 = vmul.f32 1.442695, %v2207_v28 }
0x1772   : > { %v2216_v40 = vpop.permute.xlu1 %2215 }
0x1773   : > { %3734 = vpow2.f32 %v2208_v29 }
0x1776   : > { %v2439_v51 = vpop.permute.xlu1 %2438 }
0x1779   : > { %v3733_v30 = vpop.eup %3732 }
0x177a   : > { %v2044_v31 = vsel %vm751_vm7, %v3733_v30, 0.0 }
0x177b   : > { %2045 = vadd.xlane.f32.xlu0 %v2044_v31 }
0x177d   : > { %v3735_v32 = vpop.eup %3734 }
0x177e   : > { %v2210_v33 = vsel %vm751_vm7, %v3735_v32, 0.0 }
0x177f   : > { %2211 = vadd.xlane.f32.xlu0 %v2210_v33 }
0x1795   : > { %2049 = vrot.lane.b32.xlu0 %v4310_v10, %s4552_s17  ;;  %s3116_s17 = scalar_lea.sflag [#allocation4], %s404_s16 }
0x1799   : > { %2440 = vrot.lane.b32.xlu0 %v4310_v10, %s4553_s19  ;;  %s3832_s19 = smov [#allocation3]  }
0x179a   : > { %s3758_s20 = sshll.u32 %s3832_s19, 4  ;;  %s3759_s20 = int_to_ptr.vmem [resolvable:$false] %s3758_s20 }
0x179b   : > { %s3760_s23 = scalar_lea.vmem %s3759_s20, 128 }
0x1808   : > { %v2046_v35 = vpop.xlane.xlu0 %2045 }
0x1809   : > { %3736 = vrcp.f32 %v2046_v35 }
0x180c   : > { %v2212_v36 = vpop.xlane.xlu0 %2211 }
0x180d   : > { %3738 = vrcp.f32 %v2212_v36 }
0x1810   : > { %v2050_v37 = vpop.permute.xlu0 %2049 }
0x1811   : > { %3482 = vmatpush3.msk.msra.mxu1 %vm769_vm8, %v2050_v37  ;;  %v2922_v37 = vrot.slane %v4296_v61, %v1637_v46  ;;  %v3234_v46 = vld [vmem:[%s4530_s7 + $0x20] sm:$0xff] }
0x1812   : > { %3491 = vmatprep.subr.mxu1 %v3820_v8 }
0x1813   : > { %v3737_v38 = vpop.eup %3736 }
0x1814   : > { %v2048_v39 = vmul.f32 %v3737_v38, %v3733_v30  ;;  %v2441_v49 = vpop.permute.xlu0 %2440 }
0x1816   : > { %3484 = vmatmul.mubr.msk.f32.vlgmr.msra.gmra.mrb[24].mxu1 %vm765_vm9, %v2048_v39 }
0x1817   : > { %v3739_v26 = vpop.eup %3738  ;;  %3492 = vmatpush3.msk.msra.mxu1 %vm769_vm8, %v2216_v40  ;;  %3493 = vmatprep.mubr.msk.f32.mxu1 %vm3819_vm4, %v3820_v8 }
0x1818   : > { %v2214_v42 = vmul.f32 %v3739_v26, %v3735_v32  ;;  %3501 = vmatprep.subr.mxu1 %v3820_v8 }
0x181a   : > { %3494 = vmatmul.mubr.msk.f32.vlgmr.msra.gmra.mrb[26].mxu1 %vm765_vm9, %v2214_v42 }
0x181b   : > { %3503 = vmatprep.mubr.msk.f32.mxu1 %vm3819_vm4, %v3820_v8  ;;  %3502 = vmatpush3.msra.mxu1 %v3230_v43 }
0x181c   : > { %3511 = vmatprep.subr.mxu1 %v3820_v8 }
0x18e9   : > { %v2122_v44 = vpop.f32.mrb[24].mxu1 }
0x18ea   : > { %v3485_v47 = vpop.f32.mrb[25].mxu1  ;;  %3504 = vmatmul.mubr.msk.f32.vlgmr.msra.gmra.mrb[28].mxu1 %vm676_vm6, %v2122_v44 }
0x18eb   : > { %3513 = vmatprep.mubr.msk.f32.mxu1 %vm3819_vm4, %v3820_v8 }
0x18ed   : > { %v2288_v48 = vpop.f32.mrb[26].mxu1 }
0x18ee   : > { %v3495_v50 = vpop.f32.mrb[27].mxu1  ;;  %3499 = vmatmul.mubr.msk.f32.vlgmr.msra.gmra.mrb[14].mxu0 %vm676_vm6, %v2288_v48 }
0x18ef   : > { %3507 = vmatpush3.xpose.msk.msra.mxu0 %vm676_vm6, %v2441_v49  ;;  %3508 = vmatprep.mubr.msk.f32.mxu0 %vm3819_vm4, %v3820_v8  ;;  %v3236_v49 = vld [vmem:[%s4530_s7 + $0x30] sm:$0xff]  ;;  %v3237_v50 = vld [vmem:[%s4530_s7 + $0x38] sm:$0xff] }
0x18f0   : > { %3516 = vmatprep.subr.mxu0 %v3820_v8 }
0x18f2   : > { %3509 = vmatmul.mubr.msk.f32.vlgmr.msra.gmra.mrb[16].mxu0 %vm676_vm6, %v2439_v51  ;;  %v3636_v51 = vpack.c.bf16 %v3237_v50, %v3236_v49 }
0x18f3   : > { %3518 = vmatprep.mubr.msk.f32.mxu0 %vm3819_vm4, %v3820_v8  ;;  %3517 = vmatpush3.msra.mxu0 %v3232_v17  ;;  %v3269_v17 = vld [vmem:[%s4534_s11 + $0x1] ss:$0 sm:$0xff] }
0x18f4   : > { %3526 = vmatprep.subr.mxu0 %v3820_v8 }
0x19bd   : > { %v2434_v53 = vpop.f32.mrb[28].mxu1 }
0x19be   : > { %v3505_v16 = vpop.f32.mrb[29].mxu1 }
0x19c1   : > { %v2361_v52 = vpop.f32.mrb[14].mxu0 }
0x19c2   : > { %v2435_v54 = vadd.f32 %v2434_v53, %v2361_v52  ;;  %v3500_v55 = vpop.f32.mrb[15].mxu0 }
0x19c5   : > { %v2512_v56 = vpop.f32.mrb[16].mxu0 }
0x19c6   : > { %v3510_v57 = vpop.f32.mrb[17].mxu0  ;;  %v2516_v58 = vsel %vm751_vm7, %v2512_v56, -inf }
0x19c7   : > { %2517 = vmax.xlane.f32.xlu0 %v2516_v58  ;;  %v2945_v57 = vrot.slane %v4296_v61, %v1660_v6  ;;  %v3242_v6 = vld [vmem:[%s4531_s8 + $0x58] sm:$0xff] }
0x19dd   : > { %2527 = vrot.lane.b32.xlu0 %v4310_v10, %s4554_s26  ;;  %s3274_s26 = sshll.u32 %s3919_s25, 6 }
0x19e1   : > { %2678 = vrot.lane.b32.xlu0 %v4310_v10, %s4555_s28  ;;  %s406_s28 = scalar_lea.vmem [#allocation3], %s3192_s18 }
0x1a54   : > { %v2518_v60 = vpop.xlane.xlu0 %2517 }
0x1a55   : > { %v2519_v59 = vsub.f32 %v2512_v56, %v2518_v60 }
0x1a57   : > { %v2520_v62 = vmul.f32 1.442695, %v2519_v59  ;;  %v3239_v59 = vld [vmem:[%s4531_s8 + $0x40] sm:$0xff] }
0x1a58   : > { %v2528_v63 = vpop.permute.xlu0 %2527 }
0x1a59   : > { %3740 = vpow2.f32 %v2520_v62  ;;  %3512 = vmatpush3.msk.msra.mxu1 %vm769_vm8, %v2528_v63  ;;  %v3240_v62 = vld [vmem:[%s4531_s8 + $0x48] sm:$0xff] }
0x1a5a   : > { %3521 = vmatprep.subr.mxu1 %v3820_v8  ;;  %v3639_v63 = vpack.c.bf16 %v3240_v62, %v3239_v59 }
0x1a5c   : > { %v2679_v15 = vpop.permute.xlu0 %2678 }
0x1a63   : > { %v3741_v0 = vpop.eup %3740 }
0x1a64   : > { %v2522_v1 = vsel %vm751_vm7, %v3741_v0, 0.0 }
0x1a65   : > { %2523 = vadd.xlane.f32.xlu1 %v2522_v1  ;;  %v3243_v1 = vld [vmem:[%s4531_s8 + $0x60] sm:$0xff] }
0x1a76   : > { %2680 = vrot.lane.b32.xlu1 %v4310_v10, %s4556_s15  ;;  %s3129_s15 = sshll.u32 %s406_s28, 4  ;;  %s4483_s15 = int_to_ptr.vmem [resolvable:$true] %s3129_s15 }
0x1a77   : > { %s3754_s25 = scalar_lea.vmem %s4483_s15, 64  ;;  %p3761_p0 = scmp.lt.s32.totalorder %s4483_s15, %s3759_s20 }
0x1a78   : > { %p3755_p11 = scmp.ne.s32.totalorder %s4483_s15, %s3754_s25  ;;  %p3762_p1 = scmp.lt.s32.totalorder %s3760_s23, %s3754_s25 }
0x1a7a   : > { %p3756_p12 = pnand %p3755_p11, %p3936_p5  ;;  %p3763_p2 = por %p3762_p1, %p3761_p0 }
0x1a7c   : > { %p3757_p13 = pneg %p3756_p12 }
0x1a7e   : > { %p3764_p3 = pnand %p3763_p2, %p3757_p13 }
0x1af2   : > { %v2524_v2 = vpop.xlane.xlu1 %2523 }
0x1af3   : > { %3742 = vrcp.f32 %v2524_v2  ;;  %v3244_v2 = vld [vmem:[%s4531_s8 + $0x68] sm:$0xff] }
0x1af6   : > { %v2681_v9 = vpop.permute.xlu1 %2680 }
0x1afd   : > { %v3743_v4 = vpop.eup %3742 }
0x1afe   : > { %v2526_v7 = vmul.f32 %v3743_v4, %v3741_v0  ;;  %v3645_v4 = vpack.c.bf16 %v3244_v2, %v3243_v1 }
0x1b00   : > { %3514 = vmatmul.mubr.msk.f32.vlgmr.msra.gmra.mrb[30].mxu1 %vm765_vm9, %v2526_v7  ;;  %v3245_v7 = vld [vmem:[%s4531_s8 + $0x70] sm:$0xff] }
0x1b01   : > { %3522 = vmatpush3.xpose.msk.msra.mxu1 %vm676_vm6, %v2681_v9  ;;  %3523 = vmatprep.mubr.msk.f32.mxu1 %vm3819_vm4, %v3820_v8  ;;  %v3246_v9 = vld [vmem:[%s4531_s8 + $0x78] sm:$0xff] }
0x1b02   : > { %3531 = vmatprep.subr.mxu1 %v3820_v8 }
0x1b04   : > { %3524 = vmatmul.mubr.msk.f32.vlgmr.msra.gmra.mrb[32].mxu1 %vm676_vm6, %v2679_v15  ;;  %v3648_v15 = vpack.c.bf16 %v3246_v9, %v3245_v7 }
0x1b05   : > { %3533 = vmatprep.mubr.msk.f32.mxu1 %vm3819_vm4, %v3820_v8  ;;  %3532 = vmatpush3.msra.mxu1 %v3233_v25 }
0x1b06   : > { %3638 = vmatprep.subr.bf16.mxu1 %v3818_v3 }
0x1bd3   : > { %v2600_v11 = vpop.f32.mrb[30].mxu1 }
0x1bd4   : > { %v3515_v12 = vpop.f32.mrb[31].mxu1  ;;  %3519 = vmatmul.mubr.msk.f32.vlgmr.msra.gmra.mrb[18].mxu0 %vm676_vm6, %v2600_v11 }
0x1bd5   : > { %3528 = vmatprep.mubr.msk.f32.mxu0 %vm3819_vm4, %v3820_v8 }
0x1bd7   : > { %v2752_v13 = vpop.f32.mrb[32].mxu1 }
0x1bd8   : > { %v3525_v18 = vpop.f32.mrb[33].mxu1  ;;  %v2756_v19 = vsel %vm751_vm7, %v2752_v13, -inf }
0x1bd9   : > { %2757 = vmax.xlane.f32.xlu1 %v2756_v19 }
0x1c66   : > { %v2758_v20 = vpop.xlane.xlu1 %2757 }
0x1c67   : > { %v2759_v21 = vsub.f32 %v2752_v13, %v2758_v20 }
0x1c69   : > { %v2760_v22 = vmul.f32 1.442695, %v2759_v21 }
0x1c6b   : > { %3744 = vpow2.f32 %v2760_v22 }
0x1c75   : > { %v3745_v23 = vpop.eup %3744 }
0x1c76   : > { %v2762_v24 = vsel %vm751_vm7, %v3745_v23, 0.0 }
0x1c77   : > { %2763 = vadd.xlane.f32.xlu0 %v2762_v24 }
0x1c8d   : > { %2767 = vrot.lane.b32.xlu0 %v4310_v10, %s4557_s27  ;;  %s4481_s27 = scalar_lea.hbm %s4535_s12, %s3274_s26 }
0x1ca7   : > { %v2673_v27 = vpop.f32.mrb[18].mxu0 }
0x1ca8   : > { %v2677_v28 = vadd.f32 %v2673_v27, %v2435_v54  ;;  %v3520_v29 = vpop.f32.mrb[19].mxu0  ;;  %v2940_v54 = vrot.slane %v4296_v61, %v1655_v5  ;;  %v3241_v5 = vld [vmem:[%s4531_s8 + $0x50] sm:$0xff] }
0x1ca9   : > { %v3642_v0 = vpack.c.bf16 %v3242_v6, %v3241_v5 }
0x1d04   : > { %v2764_v30 = vpop.xlane.xlu0 %2763 }
0x1d05   : > { %3746 = vrcp.f32 %v2764_v30 }
0x1d08   : > { %v2768_v31 = vpop.permute.xlu0 %2767 }
0x1d09   : > { %3527 = vmatpush3.msk.msra.mxu0 %vm769_vm8, %v2768_v31 }
0x1d0a   : > { %3632 = vmatprep.subr.bf16.mxu0 %v3818_v3 }
0x1d0f   : > { %v3747_v32 = vpop.eup %3746 }
0x1d10   : > { %v2766_v33 = vmul.f32 %v3747_v32, %v3745_v23  ;;  %v3111_v23 = vrot.slane %v4296_v61, %v1826_v41 }
0x1d12   : > { %3529 = vmatmul.mubr.msk.f32.vlgmr.msra.gmra.mrb[20].mxu0 %vm765_vm9, %v2766_v33 }
0x1d13   : > { %3544 = vmatprep.mubr.msk.f32.mxu0 %vm3819_vm4, %v3820_v8 }
0x1de5   : > { %v2840_v10 = vpop.f32.mrb[20].mxu0 }
0x1de6   : > { %v3530_v34 = vpop.f32.mrb[21].mxu0  ;;  %3534 = vmatmul.mubr.msk.f32.vlgmr.msra.gmra.mrb[34].mxu1 %vm676_vm6, %v2840_v10 }
0x1de7   : > { %3563 = vmatprep.mubr.msk.f32.mxu1 %vm3819_vm4, %v3820_v8  ;;  %3640 = vmatpush3.bf16.msra.mxu1 %v3639_v63 }
0x1de8   : > { %3641 = vmatprep.subr.bf16.mxu1 %v3818_v3 }
0x1deb   : > { %3643 = vmatpush3.bf16.msra.mxu1 %v3642_v0 }
0x1dec   : > { %3644 = vmatprep.subr.bf16.mxu1 %v3818_v3 }
0x1def   : > { %3646 = vmatpush3.bf16.msra.mxu1 %v3645_v4 }
0x1df0   : > { %3647 = vmatprep.subr.bf16.mxu1 %v3818_v3 }
0x1df3   : > { %3649 = vmatpush3.bf16.msra.mxu1 %v3648_v15 }
0x1eb9   : > { %v2913_v35 = vpop.f32.mrb[34].mxu1 }
0x1eba   : > { %v2917_v36 = vadd.f32 %v2913_v35, %v2677_v28  ;;  %v3535_v38 = vpop.f32.mrb[35].mxu1 }
0x1ebc   : > { %v2918_v39 = vadd.f32 %v2917_v36, %v4273_v45  ;;  %v3235_v45 = vld [vmem:[%s4530_s7 + $0x28] sm:$0xff] }
0x1ebd   : > { %v3633_v48 = vpack.c.bf16 %v3235_v45, %v3234_v46 }
0x1ebe   : > { %v4415_v40 = vadd.f32 %v2922_v37, %v2918_v39 }
0x1ebf   : > { %3634 = vmatpush3.bf16.msra.mxu0 %v3633_v48 }
0x1ec0   : > { %v2924_v26 = vsel %vm522_vm3, %v4415_v40, 0.0  ;;  %3635 = vmatprep.subr.bf16.mxu0 %v3818_v3 }
0x1ec1   : > { %2925 = vadd.xlane.f32.xlu1 %v2924_v26 }
0x1ec3   : > { %3637 = vmatpush3.bf16.msra.mxu0 %v3636_v51 }
0x1f4e   : > { %v2926_v42 = vpop.xlane.xlu1 %2925 }
0x1f4f   : > { %v2927_v43 = vmul.f32 0.03125, %v2926_v42 }
0x1f51   : > { %v2928_v44 = vsub.f32 %v4415_v40, %v2927_v43 }
0x1f53   : > { %v2929_v8 = vmul.f32 %v2928_v44, %v2928_v44 }
0x1f55   : > { %v2930_v47 = vsel %vm522_vm3, %v2929_v8, 0.0 }
0x1f56   : > { %2931 = vadd.xlane.f32.xlu1 %v2930_v47 }
0x1fe3   : > { %v2932_v53 = vpop.xlane.xlu1 %2931 }
0x1fe4   : > { %v2933_v16 = vmul.f32 0.03125, %v2932_v53 }
0x1fe6   : > { %v2934_v52 = vadd.f32 1e-05, %v2933_v16 }
0x1fe8   : > { %3748 = vrsqrt.f32 %v2934_v52 }
0x1ff2   : > { %v3749_v55 = vpop.eup %3748 }
0x1ff3   : > { %v2936_v56 = vmul.f32 %v3749_v55, %v2928_v44 }
0x1ff5   : > { %v2941_v58 = vmul.f32 %v2940_v54, %v2936_v56 }
0x1ff7   : > { %v2946_v60 = vadd.f32 %v2945_v57, %v2941_v58 }
0x1ff9   : > { %3545 = vmatmul.mubr.msk.f32.vlgmr.msra.gmra.mrb[22].mxu0 %vm599_vm5, %v2946_v60 }
0x20cc   : > { %v3022_v11 = vpop.f32.mrb[22].mxu0 }
0x20cd   : > { %v3023_v12 = vadd.f32 %v3269_v17, %v3022_v11  ;;  %v3546_v13 = vpop.f32.mrb[23].mxu0 }
0x20cf   : > { %v3271_v3 = vmul.f32 -1.702, %v3023_v12 }
0x20d1   : > { %v3028_v18 = vmul.f32 1.442695, %v3271_v3 }
0x20d3   : > { %3750 = vpow2.f32 %v3028_v18 }
0x20dd   : > { %v3751_v19 = vpop.eup %3750 }
0x20de   : > { %v3030_v20 = vadd.f32 1.0, %v3751_v19 }
0x20e0   : > { %3752 = vrcp.f32 %v3030_v20 }
0x20ea   : > { %v3753_v21 = vpop.eup %3752 }
0x20eb   : > { %v3033_v22 = vmul.f32 %v3753_v21, %v3023_v12 }
0x20ed   : > { %3564 = vmatmul.mubr.msk.f32.vlgmr.msra.gmra.mrb[36].mxu1 %vm439_vm0, %v3033_v22 }
0x21c0   : > { %v3103_v24 = vpop.f32.mrb[36].mxu1 }
0x21c1   : > { %v3107_v25 = vadd.f32 %v3103_v24, %v4415_v40  ;;  %v3565_v27 = vpop.f32.mrb[37].mxu1 }
0x21c3   : > { %v3112_v28 = vadd.f32 %v3111_v23, %v3107_v25 }
0x21c5   : > { %3114 = vst.msk [vmem:[%s406_s28 - $0x1] sm:$0x1e] %vm3113_vm10, %v3112_v28 }
0x21c6   : > { %3767 = shalt.err (!%p3764_p3)
}
0x21c7   : > { %s3768_s16 = scalar_lea.hbm %s4481_s27, 64  ;;  %s3772_s28 = scalar_lea.hbm %s4535_s12, 128 }
0x21c8   : > { %p3769_p4 = scmp.ne.s32.totalorder %s4481_s27, %s3768_s16  ;;  %p3773_p9 = scmp.lt.u32.totalorder %s4481_s27, %s4535_s12 }
0x21c9   : > { %p3774_p10 = scmp.lt.u32.totalorder %s3772_s28, %s3768_s16  ;;  %p3776_p12 = scmp.lt.u32.totalorder %s3768_s16, %s4481_s27 }
0x21ca   : > { %p3770_p7 = pnand %p3769_p4, %p3936_p5 }
0x21cb   : > { %p3775_p11 = por %p3774_p10, %p3773_p9 }
0x21cc   : > { %p3771_p8 = pneg %p3770_p7 }
0x21cd   : > { %p3777_p13 = por %p3776_p12, %p3775_p11 }
0x21cf   : > { %p3778_p0 = pnand %p3777_p13, %p3771_p8 }
0x21d1   : > { %3781 = shalt.err (!%p3778_p0)
}
0x21d2   : > { %3650 = dma.vmem_to_hbm [thread:$0]  (%p3936_p5), %s4483_s15, 64, %s4481_s27, %s3116_s17  }
0x21d3 PF: > { %p3656_p1 = scmp.ge.s32.totalorder %s3816_s24, 2  ;;  %s3141_s25 = sand.u32 1, %s3804_s21  }
0x21d4   : > { %s3142_s19 = scalar_lea.sflag [#allocation4], %s3141_s25 }
0x21d5   : > { %p3653_p2 = pnand %p3656_p1, %p3940_p6 }
0x21d7   : > { %3799 = dma.done.wait (!%p3653_p2), %s3142_s19, 64  }
0x21d8   : > { %3801 = vsyncadd (!%p3653_p2), %s3142_s19, 4294967232  ;;  %s4558_s24 = sld [smem:[#allocation7_spill]]  ;;  %s4559_s20 = sld [smem:[#allocation6_spill]] }
0x21d9   : > { %s4560_s23 = sld [smem:[#allocation8_spill]]  ;;  %s4561_s21 = smov %s3808_s22 }
0x21de   : > { %p22_p3 = scmp.ge.s32.totalorder %s4558_s24, 4   ;;  %s4562_s22 = smov %s4559_s20 }
0x21e0   :  { %24 = sbr.rel (!%p22_p3) target bundleno = 3 (0x3), region = 110 }
0x21e7   :  { %3147 = vsyncpa [#allocation4], 1 }
0x21e8   :  { %3149 = vsyncpa [#allocation4 + $0x1], 1 }

</bundles_post_ra>
